<compile_context>
chip_gen: v7x
topology: tpu7x:2x2x1
jax: 0.10.0
libtpu: 0.0.40
codegen_flags: <defaults>
</compile_context>

<pallas_src>
import functools
import math

import jax
import jax.numpy as jnp
from jax.experimental import pallas as pl
from jax.experimental.pallas import tpu as pltpu


# ----------------------------- fused encoder kernel -------------------------

def encoder_kernel(x_ref, g_ref, w5_ref, cos_ref, sin_ref, wo_ref, bo_ref,
                   w13_ref, w2_ref, o_ref, *, n_heads, head_dim, hidden, eps):
    d = n_heads * head_dim
    x = x_ref[...]                   # (S, D) f32  (batch dim squeezed away)
    g = g_ref[...]                   # (1, D) f32
    s_len = x.shape[0]

    def rmsnorm(t):
        # Faithful to the reference RMSNorm: var(dim=-1, unbiased=False) i.e.
        # mean-centered variance, but t itself is NOT mean-centered before scaling.
        mean = jnp.mean(t, axis=-1, keepdims=True)
        var = jnp.mean((t - mean) ** 2, axis=-1, keepdims=True)
        return g * t * jax.lax.rsqrt(var + eps)

    # --- pre-norm + fused QKV (+ pre-rotated RoPE columns), lane-dense N = 5D ---
    # bf16 MXU operands, f32 accumulation.
    xn = rmsnorm(x)
    qkv5 = jnp.dot(xn.astype(jnp.bfloat16), w5_ref[...],
                   preferred_element_type=jnp.float32)            # (S, 5D) f32

    cosf = cos_ref[...]              # (S, D) interleaved cos (f32)
    sinf = sin_ref[...]              # (S, D) interleaved sin (f32)
    # interleaved RoPE: out_even = x_e*c - x_o*s ; out_odd = x_o*c + x_e*s
    # (the 1/sqrt(head_dim) attention scale is already folded into Q / Q_rot cols)
    q = qkv5[:, 0 * d:1 * d] * cosf + qkv5[:, 3 * d:4 * d] * sinf
    k = qkv5[:, 1 * d:2 * d] * cosf + qkv5[:, 4 * d:5 * d] * sinf
    v = qkv5[:, 2 * d:3 * d]

    # --- batched (head-major) softmax attention: no per-head loop, no concat ---
    qh = jnp.transpose(q.reshape(s_len, n_heads, head_dim), (1, 0, 2)).astype(jnp.bfloat16)
    kh = jnp.transpose(k.reshape(s_len, n_heads, head_dim), (1, 0, 2)).astype(jnp.bfloat16)
    vh = jnp.transpose(v.reshape(s_len, n_heads, head_dim), (1, 0, 2)).astype(jnp.bfloat16)

    sc = jnp.einsum('hqd,hkd->hqk', qh, kh,
                    preferred_element_type=jnp.float32)            # (H, S, S) f32
    m = jnp.max(sc, axis=-1, keepdims=True)
    p = jnp.exp(sc - m)                                            # f32 EUP
    inv = pl.reciprocal(jnp.sum(p, axis=-1, keepdims=True), approx=False)
    oh = jnp.einsum('hqk,hkd->hqd', p.astype(jnp.bfloat16), vh,
                    preferred_element_type=jnp.float32) * inv      # (H, S, hd) f32
    attn = jnp.transpose(oh, (1, 0, 2)).reshape(s_len, d)          # (S, D)

    mha = jnp.dot(attn.astype(jnp.bfloat16), wo_ref[...],
                  preferred_element_type=jnp.float32) + bo_ref[...]
    x1 = x + mha

    # --- pre-norm (same gamma, as in the reference) + fused SwiGLU FFN ---
    x2n = rmsnorm(x1)
    h13 = jnp.dot(x2n.astype(jnp.bfloat16), w13_ref[...],
                  preferred_element_type=jnp.float32)              # (S, 2H)
    h1 = h13[:, :hidden]
    h3 = h13[:, hidden:]
    hh = h1 * jax.nn.sigmoid(h1) * h3                              # f32 VPU/EUP
    ffn = jnp.dot(hh.astype(jnp.bfloat16), w2_ref[...],
                  preferred_element_type=jnp.float32)

    o_ref[...] = x1 + ffn


# ----------------------------- parameter / table prep (runs once) -----------

def _rotate_weight(w):
    """Signed pair-swap of the OUTPUT columns: col 2i -> -col(2i+1), col 2i+1 -> col 2i.

    Exact (pure permutation + sign), so x @ rotate(w) == signed pair-swap of (x @ w).
    """
    d_in, d_out = w.shape
    wp = w.reshape(d_in, d_out // 2, 2)
    we, wo = wp[..., 0], wp[..., 1]
    return jnp.stack([-wo, we], axis=-1).reshape(d_in, d_out)


def prepare_params(params, seq_len, n_heads, theta=10000.0):
    """Precompute RoPE tables + fused bf16 weights once, outside the jitted forward."""
    d = params["wq"].shape[0]
    head_dim = d // n_heads

    inv_freq = 1.0 / (theta ** (jnp.arange(0, d, 2, dtype=jnp.float32) / d))   # (d/2,)
    ang = jnp.outer(jnp.arange(seq_len, dtype=jnp.float32), inv_freq)          # (s, d/2)
    cosf = jnp.repeat(jnp.cos(ang), 2, axis=-1)                                # (s, d)
    sinf = jnp.repeat(jnp.sin(ang), 2, axis=-1)                                # (s, d)

    # Fold the 1/sqrt(head_dim) attention scale into Q (and Q_rot) columns — exact.
    scale = 1.0 / math.sqrt(head_dim)
    wq_s = params["wq"] * scale

    w5 = jnp.concatenate(
        [wq_s, params["wk"], params["wv"],
         _rotate_weight(wq_s), _rotate_weight(params["wk"])], axis=1)          # (d, 5d)
    w13 = jnp.concatenate([params["w1"], params["w3"]], axis=1)                # (d, 2h)

    return {
        "gamma": params["gamma"].reshape(1, d),                 # f32 (elementwise)
        "w5": w5.astype(jnp.bfloat16),                          # MXU operand
        "cos": cosf,                                            # f32 (elementwise)
        "sin": sinf,                                            # f32 (elementwise)
        "wo": params["wo"].astype(jnp.bfloat16),                # MXU operand
        "bo": params["bo"].reshape(1, d),                       # f32 bias
        "w13": w13.astype(jnp.bfloat16),                        # MXU operand
        "w2": params["w2"].astype(jnp.bfloat16),                # MXU operand
    }


# ----------------------------- pallas_call wrapper ---------------------------

def _const_spec(shape):
    """Constant-index block: single-buffered (it never changes across grid steps)."""
    return pl.BlockSpec(shape, lambda *_: (0,) * len(shape),
                        pipeline_mode=pl.Buffered(1))


def encoder_block(x, prep, n_heads, eps=1e-8):
    b, s, d = x.shape
    hidden = prep["w2"].shape[0]
    head_dim = d // n_heads

    kern = functools.partial(encoder_kernel, n_heads=n_heads, head_dim=head_dim,
                             hidden=hidden, eps=eps)

    return pl.pallas_call(
        kern,
        out_shape=jax.ShapeDtypeStruct((b, s, d), jnp.float32),
        grid=(b,),
        in_specs=[
            pl.BlockSpec((pl.Squeezed(), s, d), lambda i: (i, 0, 0)),  # x (per batch)
            _const_spec((1, d)),                                       # gamma
            _const_spec((d, 5 * d)),                                   # fused QKV(+rot), bf16
            _const_spec((s, d)),                                       # cos table
            _const_spec((s, d)),                                       # sin table
            _const_spec((d, d)),                                       # out_proj W, bf16
            _const_spec((1, d)),                                       # out_proj b
            _const_spec((d, 2 * hidden)),                              # fused w1|w3, bf16
            _const_spec((hidden, d)),                                  # w2, bf16
        ],
        out_specs=pl.BlockSpec((pl.Squeezed(), s, d), lambda i: (i, 0, 0)),
        compiler_params=pltpu.CompilerParams(
            dimension_semantics=("parallel",)),                        # megacore: split batch
    )(x, prep["gamma"], prep["w5"], prep["cos"], prep["sin"],
      prep["wo"], prep["bo"], prep["w13"], prep["w2"])


# ----------------------------- pure-JAX reference (for self-check) ----------

def encoder_reference(x, params, n_heads, theta=10000.0, eps=1e-8):
    b, s, d = x.shape
    hd = d // n_heads

    def rms(t):
        mean = jnp.mean(t, axis=-1, keepdims=True)
        var = jnp.mean((t - mean) ** 2, axis=-1, keepdims=True)
        return params["gamma"] * t / jnp.sqrt(var + eps)

    def rope(t):
        inv_freq = 1.0 / (theta ** (jnp.arange(0, d, 2, dtype=jnp.float32) / d))
        ang = jnp.outer(jnp.arange(s, dtype=jnp.float32), inv_freq)
        cos, sin = jnp.cos(ang)[None], jnp.sin(ang)[None]
        tr = t.reshape(b, s, d // 2, 2)
        te, to = tr[..., 0], tr[..., 1]
        return jnp.stack([te * cos - to * sin, te * sin + to * cos], -1).reshape(b, s, d)

    xn = rms(x)
    q = rope(xn @ params["wq"])
    k = rope(xn @ params["wk"])
    v = xn @ params["wv"]
    q = q.reshape(b, s, n_heads, hd).transpose(0, 2, 1, 3)
    k = k.reshape(b, s, n_heads, hd).transpose(0, 2, 1, 3)
    v = v.reshape(b, s, n_heads, hd).transpose(0, 2, 1, 3)
    sc = (q @ jnp.swapaxes(k, -1, -2)) / math.sqrt(hd)
    p = jax.nn.softmax(sc, axis=-1)
    attn = (p @ v).transpose(0, 2, 1, 3).reshape(b, s, d)
    x1 = x + attn @ params["wo"] + params["bo"]
    xn2 = rms(x1)
    h1 = xn2 @ params["w1"]
    h3 = xn2 @ params["w3"]
    return x1 + (h1 * jax.nn.sigmoid(h1) * h3) @ params["w2"]


# ----------------------------- main ------------------------------------------

if __name__ == "__main__":
    # Small, module-consistent config (dim scaled down; same structure as `args`).
    B, S = 2, 8
    DIM = 128
    N_HEADS = 4                 # head_dim = 32 ; n_kv_heads == n_heads -> n_rep = 1
    MULTIPLE_OF = 256
    hidden = 4 * DIM
    hidden = int(2 * hidden / 3)
    hidden = MULTIPLE_OF * ((hidden + MULTIPLE_OF - 1) // MULTIPLE_OF)   # 512

    key = jax.random.PRNGKey(0)
    keys = jax.random.split(key, 10)

    def w(k, shape, scale=0.02):
        return scale * jax.random.normal(k, shape, dtype=jnp.float32)

    params = {
        "gamma": jnp.ones((DIM,), jnp.float32),
        "wq": w(keys[0], (DIM, DIM)),
        "wk": w(keys[1], (DIM, DIM)),
        "wv": w(keys[2], (DIM, DIM)),
        "wo": w(keys[3], (DIM, DIM)),
        "bo": w(keys[4], (DIM,)),
        "w1": w(keys[5], (DIM, hidden)),
        "w3": w(keys[6], (DIM, hidden)),
        "w2": w(keys[7], (hidden, DIM)),
    }
    x = jax.random.normal(keys[8], (B, S, DIM), dtype=jnp.float32)

    prep = prepare_params(params, seq_len=S, n_heads=N_HEADS)   # once, outside jit
    fwd = jax.jit(functools.partial(encoder_block, n_heads=N_HEADS))
    out = fwd(x, prep)
    jax.block_until_ready(out)

    assert out.shape == (B, S, DIM) and out.dtype == jnp.float32
    ref = encoder_reference(x, params, N_HEADS)
    err = float(jnp.max(jnp.abs(out - ref)))
    # bf16 MXU operands (f32 accumulation) dominate the residual error budget.
    assert err < 3e-2, f"mismatch vs pure-JAX reference: max abs err {err}"
    print("KERNEL_OK")
</pallas_src>

<mosaic_0001>
module attributes {stable_mosaic.version = 11 : i64} {
  func.func @encoder_kernel(%arg0: i32, %arg1: memref<1x8x128xf32, #tpu.memory_space<vmem>>, %arg2: memref<1x128xf32, #tpu.memory_space<vmem>>, %arg3: memref<128x640xbf16, #tpu.memory_space<vmem>>, %arg4: memref<8x128xf32, #tpu.memory_space<vmem>>, %arg5: memref<8x128xf32, #tpu.memory_space<vmem>>, %arg6: memref<128x128xbf16, #tpu.memory_space<vmem>>, %arg7: memref<1x128xf32, #tpu.memory_space<vmem>>, %arg8: memref<128x1024xbf16, #tpu.memory_space<vmem>>, %arg9: memref<512x128xbf16, #tpu.memory_space<vmem>>, %arg10: memref<1x8x128xf32, #tpu.memory_space<vmem>>) attributes {dimension_semantics = [#tpu.dimension_semantics<parallel>], iteration_bounds = array<i64: 2>, scalar_prefetch = 0 : i64, scratch_operands = 0 : i64, tpu.core_type = #tpu.core_type<tc>, window_params = [{transform_indices = @transform_0, window_bounds = array<i64: 1, 8, 128>}, {pipeline_mode = #tpu.pipeline_mode<synchronous>, transform_indices = @transform_1, window_bounds = array<i64: 1, 128>}, {pipeline_mode = #tpu.pipeline_mode<synchronous>, transform_indices = @transform_2, window_bounds = array<i64: 128, 640>}, {pipeline_mode = #tpu.pipeline_mode<synchronous>, transform_indices = @transform_3, window_bounds = array<i64: 8, 128>}, {pipeline_mode = #tpu.pipeline_mode<synchronous>, transform_indices = @transform_4, window_bounds = array<i64: 8, 128>}, {pipeline_mode = #tpu.pipeline_mode<synchronous>, transform_indices = @transform_5, window_bounds = array<i64: 128, 128>}, {pipeline_mode = #tpu.pipeline_mode<synchronous>, transform_indices = @transform_6, window_bounds = array<i64: 1, 128>}, {pipeline_mode = #tpu.pipeline_mode<synchronous>, transform_indices = @transform_7, window_bounds = array<i64: 128, 1024>}, {pipeline_mode = #tpu.pipeline_mode<synchronous>, transform_indices = @transform_8, window_bounds = array<i64: 512, 128>}, {transform_indices = @transform_9, window_bounds = array<i64: 1, 8, 128>}]} {
    %c0 = arith.constant 0 : index
    %c0_0 = arith.constant 0 : index
    %c0_1 = arith.constant 0 : index
    %0 = vector.load %arg1[%c0, %c0_0, %c0_1] : memref<1x8x128xf32, #tpu.memory_space<vmem>>, vector<1x8x128xf32>
    %1 = vector.shape_cast %0 : vector<1x8x128xf32> to vector<8x128xf32>
    %c0_2 = arith.constant 0 : index
    %c0_3 = arith.constant 0 : index
    %2 = vector.load %arg2[%c0_2, %c0_3] : memref<1x128xf32, #tpu.memory_space<vmem>>, vector<1x128xf32>
    %cst = arith.constant dense<0.000000e+00> : vector<8xf32>
    %3 = vector.multi_reduction <add>, %1, %cst [1] : vector<8x128xf32> to vector<8xf32>
    %4 = vector.shape_cast %3 : vector<8xf32> to vector<8x1xf32>
    %cst_4 = arith.constant 1.280000e+02 : f32
    %5 = vector.broadcast %cst_4 : f32 to vector<8x1xf32>
    %6 = arith.divf %4, %5 : vector<8x1xf32>
    %7 = vector.broadcast %6 : vector<8x1xf32> to vector<8x128xf32>
    %8 = arith.subf %1, %7 : vector<8x128xf32>
    %9 = arith.mulf %8, %8 : vector<8x128xf32>
    %cst_5 = arith.constant dense<0.000000e+00> : vector<8xf32>
    %10 = vector.multi_reduction <add>, %9, %cst_5 [1] : vector<8x128xf32> to vector<8xf32>
    %11 = vector.shape_cast %10 : vector<8xf32> to vector<8x1xf32>
    %cst_6 = arith.constant 1.280000e+02 : f32
    %12 = vector.broadcast %cst_6 : f32 to vector<8x1xf32>
    %13 = arith.divf %11, %12 : vector<8x1xf32>
    %14 = vector.broadcast %2 : vector<1x128xf32> to vector<8x128xf32>
    %15 = arith.mulf %14, %1 : vector<8x128xf32>
    %cst_7 = arith.constant 9.99999993E-9 : f32
    %16 = vector.broadcast %cst_7 : f32 to vector<8x1xf32>
    %17 = arith.addf %13, %16 : vector<8x1xf32>
    %18 = math.rsqrt %17 : vector<8x1xf32>
    %19 = vector.broadcast %18 : vector<8x1xf32> to vector<8x128xf32>
    %20 = arith.mulf %15, %19 : vector<8x128xf32>
    %21 = arith.truncf %20 : vector<8x128xf32> to vector<8x128xbf16>
    %c0_8 = arith.constant 0 : index
    %c0_9 = arith.constant 0 : index
    %22 = vector.load %arg3[%c0_8, %c0_9] : memref<128x640xbf16, #tpu.memory_space<vmem>>, vector<128x640xbf16>
    %cst_10 = arith.constant dense<0.000000e+00> : vector<8x640xf32>
    %23 = tpu.matmul %21, %22, %cst_10 {dimension_numbers = #tpu.dot_dimension_numbers<[1], [0], [0], [1], [0, 0, 1, 1], [], []>} : vector<8x128xbf16>, vector<128x640xbf16>, vector<8x640xf32> -> vector<8x640xf32>
    %c0_11 = arith.constant 0 : index
    %c0_12 = arith.constant 0 : index
    %24 = vector.load %arg4[%c0_11, %c0_12] : memref<8x128xf32, #tpu.memory_space<vmem>>, vector<8x128xf32>
    %c0_13 = arith.constant 0 : index
    %c0_14 = arith.constant 0 : index
    %25 = vector.load %arg5[%c0_13, %c0_14] : memref<8x128xf32, #tpu.memory_space<vmem>>, vector<8x128xf32>
    %26 = vector.extract_strided_slice %23 {offsets = [0, 0], sizes = [8, 128], strides = [1, 1]} : vector<8x640xf32> to vector<8x128xf32>
    %27 = arith.mulf %26, %24 : vector<8x128xf32>
    %28 = vector.extract_strided_slice %23 {offsets = [0, 384], sizes = [8, 128], strides = [1, 1]} : vector<8x640xf32> to vector<8x128xf32>
    %29 = arith.mulf %28, %25 : vector<8x128xf32>
    %30 = arith.addf %27, %29 : vector<8x128xf32>
    %31 = vector.extract_strided_slice %23 {offsets = [0, 128], sizes = [8, 128], strides = [1, 1]} : vector<8x640xf32> to vector<8x128xf32>
    %32 = arith.mulf %31, %24 : vector<8x128xf32>
    %33 = vector.extract_strided_slice %23 {offsets = [0, 512], sizes = [8, 128], strides = [1, 1]} : vector<8x640xf32> to vector<8x128xf32>
    %34 = arith.mulf %33, %25 : vector<8x128xf32>
    %35 = arith.addf %32, %34 : vector<8x128xf32>
    %36 = vector.extract_strided_slice %23 {offsets = [0, 256], sizes = [8, 128], strides = [1, 1]} : vector<8x640xf32> to vector<8x128xf32>
    %37 = vector.shape_cast %30 : vector<8x128xf32> to vector<8x4x32xf32>
    %38 = tpu.transpose %37, [1, 0, 2] : vector<8x4x32xf32> -> vector<4x8x32xf32>
    %39 = arith.truncf %38 : vector<4x8x32xf32> to vector<4x8x32xbf16>
    %40 = vector.shape_cast %35 : vector<8x128xf32> to vector<8x4x32xf32>
    %41 = tpu.transpose %40, [1, 0, 2] : vector<8x4x32xf32> -> vector<4x8x32xf32>
    %42 = arith.truncf %41 : vector<4x8x32xf32> to vector<4x8x32xbf16>
    %43 = vector.shape_cast %36 : vector<8x128xf32> to vector<8x4x32xf32>
    %44 = tpu.transpose %43, [1, 0, 2] : vector<8x4x32xf32> -> vector<4x8x32xf32>
    %45 = arith.truncf %44 : vector<4x8x32xf32> to vector<4x8x32xbf16>
    "tpu.trace_start"() <{level = 10 : i32, message = "hqd,hkd->hqk"}> : () -> ()
    %cst_15 = arith.constant dense<0.000000e+00> : vector<4x8x8xf32>
    %46 = tpu.matmul %39, %42, %cst_15 {dimension_numbers = #tpu.dot_dimension_numbers<[2], [2], [1], [1], [0, 0, 0, 1, 1, 1], [0], [0]>} : vector<4x8x32xbf16>, vector<4x8x32xbf16>, vector<4x8x8xf32> -> vector<4x8x8xf32>
    "tpu.trace_stop"() : () -> ()
    %cst_16 = arith.constant dense<0xFF800000> : vector<4x8xf32>
    %47 = vector.multi_reduction <maximumf>, %46, %cst_16 [2] : vector<4x8x8xf32> to vector<4x8xf32>
    %48 = vector.shape_cast %47 : vector<4x8xf32> to vector<4x8x1xf32>
    %49 = vector.broadcast %48 : vector<4x8x1xf32> to vector<4x8x8xf32>
    %50 = arith.subf %46, %49 : vector<4x8x8xf32>
    %51 = math.exp %50 : vector<4x8x8xf32>
    %cst_17 = arith.constant dense<0.000000e+00> : vector<4x8xf32>
    %52 = vector.multi_reduction <add>, %51, %cst_17 [2] : vector<4x8x8xf32> to vector<4x8xf32>
    %53 = vector.shape_cast %52 : vector<4x8xf32> to vector<4x8x1xf32>
    %54 = tpu.reciprocal %53 : vector<4x8x1xf32> -> vector<4x8x1xf32>
    %55 = arith.truncf %51 : vector<4x8x8xf32> to vector<4x8x8xbf16>
    "tpu.trace_start"() <{level = 10 : i32, message = "hqk,hkd->hqd"}> : () -> ()
    %cst_18 = arith.constant dense<0.000000e+00> : vector<4x8x32xf32>
    %56 = tpu.matmul %55, %45, %cst_18 {dimension_numbers = #tpu.dot_dimension_numbers<[2], [1], [1], [2], [0, 0, 0, 1, 1, 2], [0], [0]>} : vector<4x8x8xbf16>, vector<4x8x32xbf16>, vector<4x8x32xf32> -> vector<4x8x32xf32>
    "tpu.trace_stop"() : () -> ()
    %57 = vector.broadcast %54 : vector<4x8x1xf32> to vector<4x8x32xf32>
    %58 = arith.mulf %56, %57 : vector<4x8x32xf32>
    %59 = tpu.transpose %58, [1, 0, 2] : vector<4x8x32xf32> -> vector<8x4x32xf32>
    %60 = vector.shape_cast %59 : vector<8x4x32xf32> to vector<8x128xf32>
    %61 = arith.truncf %60 : vector<8x128xf32> to vector<8x128xbf16>
    %c0_19 = arith.constant 0 : index
    %c0_20 = arith.constant 0 : index
    %62 = vector.load %arg6[%c0_19, %c0_20] : memref<128x128xbf16, #tpu.memory_space<vmem>>, vector<128x128xbf16>
    %cst_21 = arith.constant dense<0.000000e+00> : vector<8x128xf32>
    %63 = tpu.matmul %61, %62, %cst_21 {dimension_numbers = #tpu.dot_dimension_numbers<[1], [0], [0], [1], [0, 0, 1, 1], [], []>} : vector<8x128xbf16>, vector<128x128xbf16>, vector<8x128xf32> -> vector<8x128xf32>
    %c0_22 = arith.constant 0 : index
    %c0_23 = arith.constant 0 : index
    %64 = vector.load %arg7[%c0_22, %c0_23] : memref<1x128xf32, #tpu.memory_space<vmem>>, vector<1x128xf32>
    %65 = vector.broadcast %64 : vector<1x128xf32> to vector<8x128xf32>
    %66 = arith.addf %63, %65 : vector<8x128xf32>
    %67 = arith.addf %1, %66 : vector<8x128xf32>
    %cst_24 = arith.constant dense<0.000000e+00> : vector<8xf32>
    %68 = vector.multi_reduction <add>, %67, %cst_24 [1] : vector<8x128xf32> to vector<8xf32>
    %69 = vector.shape_cast %68 : vector<8xf32> to vector<8x1xf32>
    %cst_25 = arith.constant 1.280000e+02 : f32
    %70 = vector.broadcast %cst_25 : f32 to vector<8x1xf32>
    %71 = arith.divf %69, %70 : vector<8x1xf32>
    %72 = vector.broadcast %71 : vector<8x1xf32> to vector<8x128xf32>
    %73 = arith.subf %67, %72 : vector<8x128xf32>
    %74 = arith.mulf %73, %73 : vector<8x128xf32>
    %cst_26 = arith.constant dense<0.000000e+00> : vector<8xf32>
    %75 = vector.multi_reduction <add>, %74, %cst_26 [1] : vector<8x128xf32> to vector<8xf32>
    %76 = vector.shape_cast %75 : vector<8xf32> to vector<8x1xf32>
    %cst_27 = arith.constant 1.280000e+02 : f32
    %77 = vector.broadcast %cst_27 : f32 to vector<8x1xf32>
    %78 = arith.divf %76, %77 : vector<8x1xf32>
    %79 = vector.broadcast %2 : vector<1x128xf32> to vector<8x128xf32>
    %80 = arith.mulf %79, %67 : vector<8x128xf32>
    %cst_28 = arith.constant 9.99999993E-9 : f32
    %81 = vector.broadcast %cst_28 : f32 to vector<8x1xf32>
    %82 = arith.addf %78, %81 : vector<8x1xf32>
    %83 = math.rsqrt %82 : vector<8x1xf32>
    %84 = vector.broadcast %83 : vector<8x1xf32> to vector<8x128xf32>
    %85 = arith.mulf %80, %84 : vector<8x128xf32>
    %86 = arith.truncf %85 : vector<8x128xf32> to vector<8x128xbf16>
    %c0_29 = arith.constant 0 : index
    %c0_30 = arith.constant 0 : index
    %87 = vector.load %arg8[%c0_29, %c0_30] : memref<128x1024xbf16, #tpu.memory_space<vmem>>, vector<128x1024xbf16>
    %cst_31 = arith.constant dense<0.000000e+00> : vector<8x1024xf32>
    %88 = tpu.matmul %86, %87, %cst_31 {dimension_numbers = #tpu.dot_dimension_numbers<[1], [0], [0], [1], [0, 0, 1, 1], [], []>} : vector<8x128xbf16>, vector<128x1024xbf16>, vector<8x1024xf32> -> vector<8x1024xf32>
    %89 = vector.extract_strided_slice %88 {offsets = [0, 0], sizes = [8, 512], strides = [1, 1]} : vector<8x1024xf32> to vector<8x512xf32>
    %90 = vector.extract_strided_slice %88 {offsets = [0, 512], sizes = [8, 512], strides = [1, 1]} : vector<8x1024xf32> to vector<8x512xf32>
    %91 = arith.negf %89 : vector<8x512xf32>
    %92 = math.exp %91 : vector<8x512xf32>
    %cst_32 = arith.constant 1.000000e+00 : f32
    %93 = vector.broadcast %cst_32 : f32 to vector<8x512xf32>
    %94 = arith.addf %93, %92 : vector<8x512xf32>
    %95 = arith.divf %93, %94 : vector<8x512xf32>
    %96 = arith.mulf %89, %95 : vector<8x512xf32>
    %97 = arith.mulf %96, %90 : vector<8x512xf32>
    %98 = arith.truncf %97 : vector<8x512xf32> to vector<8x512xbf16>
    %c0_33 = arith.constant 0 : index
    %c0_34 = arith.constant 0 : index
    %99 = vector.load %arg9[%c0_33, %c0_34] : memref<512x128xbf16, #tpu.memory_space<vmem>>, vector<512x128xbf16>
    %cst_35 = arith.constant dense<0.000000e+00> : vector<8x128xf32>
    %100 = tpu.matmul %98, %99, %cst_35 {dimension_numbers = #tpu.dot_dimension_numbers<[1], [0], [0], [1], [0, 0, 1, 1], [], []>} : vector<8x512xbf16>, vector<512x128xbf16>, vector<8x128xf32> -> vector<8x128xf32>
    %101 = arith.addf %67, %100 : vector<8x128xf32>
    %c0_36 = arith.constant 0 : index
    %c0_37 = arith.constant 0 : index
    %c0_38 = arith.constant 0 : index
    %102 = vector.load %arg10[%c0_36, %c0_37, %c0_38] : memref<1x8x128xf32, #tpu.memory_space<vmem>>, vector<1x8x128xf32>
    %103 = vector.shape_cast %102 : vector<1x8x128xf32> to vector<8x128xf32>
    %104 = vector.shape_cast %101 : vector<8x128xf32> to vector<1x8x128xf32>
    tpu.vector_store %arg10[%c0_36, %c0_37, %c0_38], %104 {strides = array<i32>} : memref<1x8x128xf32, #tpu.memory_space<vmem>>, vector<1x8x128xf32>,
    return
  }
  func.func @transform_0(%arg0: i32) -> (i32, i32, i32) {
    %c0_i32 = arith.constant 0 : i32
    %c0_i32_0 = arith.constant 0 : i32
    %c0_i32_1 = arith.constant 0 : i32
    return %arg0, %c0_i32, %c0_i32_0 : i32, i32, i32
  }
  func.func @transform_1(%arg0: i32) -> (i32, i32) {
    %c0_i32 = arith.constant 0 : i32
    %c0_i32_0 = arith.constant 0 : i32
    %c0_i32_1 = arith.constant 0 : i32
    return %c0_i32, %c0_i32_0 : i32, i32
  }
  func.func @transform_2(%arg0: i32) -> (i32, i32) {
    %c0_i32 = arith.constant 0 : i32
    %c0_i32_0 = arith.constant 0 : i32
    %c0_i32_1 = arith.constant 0 : i32
    return %c0_i32, %c0_i32_0 : i32, i32
  }
  func.func @transform_3(%arg0: i32) -> (i32, i32) {
    %c0_i32 = arith.constant 0 : i32
    %c0_i32_0 = arith.constant 0 : i32
    %c0_i32_1 = arith.constant 0 : i32
    return %c0_i32, %c0_i32_0 : i32, i32
  }
  func.func @transform_4(%arg0: i32) -> (i32, i32) {
    %c0_i32 = arith.constant 0 : i32
    %c0_i32_0 = arith.constant 0 : i32
    %c0_i32_1 = arith.constant 0 : i32
    return %c0_i32, %c0_i32_0 : i32, i32
  }
  func.func @transform_5(%arg0: i32) -> (i32, i32) {
    %c0_i32 = arith.constant 0 : i32
    %c0_i32_0 = arith.constant 0 : i32
    %c0_i32_1 = arith.constant 0 : i32
    return %c0_i32, %c0_i32_0 : i32, i32
  }
  func.func @transform_6(%arg0: i32) -> (i32, i32) {
    %c0_i32 = arith.constant 0 : i32
    %c0_i32_0 = arith.constant 0 : i32
    %c0_i32_1 = arith.constant 0 : i32
    return %c0_i32, %c0_i32_0 : i32, i32
  }
  func.func @transform_7(%arg0: i32) -> (i32, i32) {
    %c0_i32 = arith.constant 0 : i32
    %c0_i32_0 = arith.constant 0 : i32
    %c0_i32_1 = arith.constant 0 : i32
    return %c0_i32, %c0_i32_0 : i32, i32
  }
  func.func @transform_8(%arg0: i32) -> (i32, i32) {
    %c0_i32 = arith.constant 0 : i32
    %c0_i32_0 = arith.constant 0 : i32
    %c0_i32_1 = arith.constant 0 : i32
    return %c0_i32, %c0_i32_0 : i32, i32
  }
  func.func @transform_9(%arg0: i32) -> (i32, i32, i32) {
    %c0_i32 = arith.constant 0 : i32
    %c0_i32_0 = arith.constant 0 : i32
    %c0_i32_1 = arith.constant 0 : i32
    return %arg0, %c0_i32, %c0_i32_0 : i32, i32, i32
  }
}

</mosaic_0001>

<bundles_post_ra>
// kernel: encoder_block.1
= control target key start
LH: loop header
LB: loop body
LE: loop exit
PB: predicated region body
PF: predicated region fallthrough
CT: control target
= control target key end

     0   :  { %s4479_s0 = inlined_call_operand.hbm [shape: f32[2,8,128], index: 0, kind: input, shape index: {}]   ;;  %s4480_s1 = inlined_call_operand.vmem [shape: f32[1,128], index: 1, kind: input, shape index: {}]   ;;  %s4481_s2 = inlined_call_operand.hbm [shape: bf16[128,640], index: 2, kind: input, shape index: {}]   ;;  %s4482_s3 = inlined_call_operand.hbm [shape: f32[8,128], index: 3, kind: input, shape index: {}]   ;;  %s4483_s4 = inlined_call_operand.vmem [shape: f32[8,128], index: 4, kind: input, shape index: {}]   ;;  %s4484_s5 = inlined_call_operand.hbm [shape: bf16[128,128], index: 5, kind: input, shape index: {}]   ;;  %s4485_s6 = inlined_call_operand.vmem [shape: f32[1,128], index: 6, kind: input, shape index: {}]   ;;  %s4486_s7 = inlined_call_operand.hbm [shape: bf16[128,1024], index: 7, kind: input, shape index: {}]   ;;  %s4487_s8 = inlined_call_operand.hbm [shape: bf16[512,128], index: 8, kind: input, shape index: {}]   ;;  %s4488_s9 = inlined_call_operand.hbm [shape: f32[2,8,128], index: 9, kind: output, shape index: {}]  }
   0x1   :  { %4495 = sst [smem:[#allocation19_spill]] %s4488_s9 }
   0x2   :  { %14 = vsyncpa [#allocation3], 0 }
   0x3   :  { %16 = vsyncpa [#allocation3 + $0x1], 0 }
   0x4   :  { %17 = vsyncpa [#allocation6], 0 }
   0x5   :  { %18 = vsyncpa [#allocation9], 0 }
   0x6   :  { %19 = vsyncpa [#allocation12], 0 }
   0x7   :  { %20 = vsyncpa [#allocation4], 0 }
   0x8   :  { %22 = vsyncpa [#allocation4 + $0x1], 0  ;;  %s3950_s30 = smov 0   ;;  %s3952_s10 = smov 0  }
   0x9   :  { %s3954_s11 = smov 0   ;;  %s3956_s12 = smov 0  }
   0xa LB: > { %s3879_s13 = smov [#allocation5]   ;;  %s3971_s15 = sadd.s32 4294967295, %s3877_s12   ;;  %s3877_s12 = sphi %s3956_s12, %s4520_s12   ;;  %s3873_s11 = sphi %s3954_s11, %s4519_s11   ;;  %s3869_s10 = sphi %s3952_s10, %s4518_s10   ;;  %s3865_s30 = sphi %s3950_s30, %s4517_s30  }
   0xb   : > { %s268_s14 = sshll.u32 %s3879_s13, 4  ;;  %p3031_p0 = scmp.ge.s32.totalorder %s3877_s12, 1  ;;  %s3976_s14 = int_to_ptr.vmem [resolvable:$true] %s268_s14 }
   0xc   : > { %p4490_p1 = scmp.eq.s32.totalorder %s3971_s15, 0  ;;  %p253_p2 = scmp.lt.s32.totalorder %s3877_s12, 3 }
   0xd   : > { %s3880_s17 = smov [#allocation8]   ;;  %s3881_s20 = smov [#allocation7]  }
   0xe   : > { %p3978_p3 = pnand %p3031_p0, %p253_p2  ;;  %s295_s18 = sshll.u32 %s3880_s17, 4  ;;  %s3991_s18 = int_to_ptr.vmem [resolvable:$true] %s295_s18 }
   0xf   : > { %s3993_s21 = sshll.u32 %s3881_s20, 4  ;;  %s3629_s24 = scalar_lea.hbm %s4481_s2, 5120  ;;  %s283_s21 = int_to_ptr.vmem [resolvable:$true] %s3993_s21 }
  0x10   : > { %s4496_s16 = scalar_select %p3978_p3, 1, 0 }
  0x11   : > { %p3408_p5 = pneg %p3978_p3  ;;  %p3630_p7 = scmp.ne.s32.totalorder %s4481_s2, %s3629_s24 }
  0x12   : > { %p3636_p11 = scmp.lt.u32.totalorder %s3629_s24, %s4481_s2 }
  0x13   : > { %p3987_p6 = pnand %p3408_p5, %p4490_p1 }
  0x15   : > { %p4003_p8 = pneg %p3987_p6 }
  0x17   : > { %p3632_p9 = pnand %p4003_p8, %p3630_p7 }
  0x19   : > { %p3633_p10 = pneg %p3632_p9 }
  0x1b   : > { %p3638_p12 = pnand %p3636_p11, %p3633_p10 }
  0x1d   : > { %3641 = shalt.err (!%p3638_p12)
}
  0x1e   : > { %s3642_s13 = scalar_lea.vmem %s3976_s14, 5120  ;;  %p3650_p5 = scmp.lt.s32.totalorder %s3976_s14, %s3976_s14 }
  0x1f   : > { %p3643_p13 = scmp.ne.s32.totalorder %s3976_s14, %s3642_s13  ;;  %p3651_p4 = scmp.lt.s32.totalorder %s3642_s13, %s3642_s13 }
  0x21   : > { %p3645_p0 = pnand %p3643_p13, %p4003_p8  ;;  %p3652_p7 = por %p3651_p4, %p3650_p5 }
  0x23   : > { %p3646_p2 = pneg %p3645_p0 }
  0x25   : > { %p3653_p9 = pnand %p3652_p7, %p3646_p2 }
  0x27   : > { %3656 = shalt.err (!%p3653_p9)
}
  0x28   : > { %s3882_s17 = smov 320   ;;  %s3883_s20 = smov 20  }
  0x29   : > { %3411 = dma.hbm_to_vmem [thread:$0]  (!%p3987_p6), %s4481_s2, 5120, %s3976_s14, [#allocation6], %s3882_s17, %s3882_s17, %s3883_s20  }
  0x2a   : > { %s3657_s26 = scalar_lea.hbm %s4484_s5, 1024 }
  0x2b   : > { %p3658_p4 = scmp.ne.s32.totalorder %s4484_s5, %s3657_s26  ;;  %p3664_p12 = scmp.lt.u32.totalorder %s3657_s26, %s4484_s5 }
  0x2d   : > { %p3660_p10 = pnand %p3658_p4, %p4003_p8 }
  0x2f   : > { %p3661_p11 = pneg %p3660_p10 }
  0x31   : > { %p3666_p13 = pnand %p3664_p12, %p3661_p11 }
  0x33   : > { %3669 = shalt.err (!%p3666_p13)
}
  0x34   : > { %s3670_s14 = scalar_lea.vmem %s3991_s18, 1024  ;;  %p3678_p7 = scmp.lt.s32.totalorder %s3991_s18, %s3991_s18 }
  0x35   : > { %p3671_p0 = scmp.ne.s32.totalorder %s3991_s18, %s3670_s14  ;;  %p3679_p9 = scmp.lt.s32.totalorder %s3670_s14, %s3670_s14 }
  0x37   : > { %p3673_p2 = pnand %p3671_p0, %p4003_p8  ;;  %p3680_p4 = por %p3679_p9, %p3678_p7 }
  0x39   : > { %p3674_p5 = pneg %p3673_p2 }
  0x3b   : > { %p3681_p10 = pnand %p3680_p4, %p3674_p5 }
  0x3d   : > { %3684 = shalt.err (!%p3681_p10)
}
  0x3e   : > { %s4492_s17 = smov 64   ;;  %s4493_s9 = smov 4  }
  0x3f   : > { %3417 = dma.hbm_to_vmem [thread:$0]  (!%p3987_p6), %s4484_s5, 1024, %s3991_s18, [#allocation9], %s4492_s17, %s4492_s17, %s4493_s9  }
  0x40   : > { %s3685_s25 = scalar_lea.hbm %s4482_s3, 128 }
  0x41   : > { %p3686_p11 = scmp.ne.s32.totalorder %s4482_s3, %s3685_s25  ;;  %p3692_p0 = scmp.lt.u32.totalorder %s3685_s25, %s4482_s3 }
  0x43   : > { %p3688_p12 = pnand %p3686_p11, %p4003_p8 }
  0x45   : > { %p3689_p13 = pneg %p3688_p12 }
  0x47   : > { %p3694_p2 = pnand %p3692_p0, %p3689_p13 }
  0x49   : > { %3697 = shalt.err (!%p3694_p2)
}
  0x4a   : > { %s3698_s14 = scalar_lea.vmem %s283_s21, 128  ;;  %p3706_p4 = scmp.lt.s32.totalorder %s283_s21, %s283_s21 }
  0x4b   : > { %p3699_p5 = scmp.ne.s32.totalorder %s283_s21, %s3698_s14  ;;  %p3707_p10 = scmp.lt.s32.totalorder %s3698_s14, %s3698_s14 }
  0x4d   : > { %p3701_p7 = pnand %p3699_p5, %p4003_p8  ;;  %p3708_p1 = por %p3707_p10, %p3706_p4 }
  0x4f   : > { %p3702_p9 = pneg %p3701_p7 }
  0x51   : > { %p3709_p3 = pnand %p3708_p1, %p3702_p9 }
  0x53   : > { %3712 = shalt.err (!%p3709_p3)
}
  0x54   : > { %3414 = dma.hbm_to_vmem [thread:$0]  (!%p3987_p6), %s4482_s3, 128, %s283_s21, [#allocation6]  }
  0x55   : > { %s3886_s22 = smov [#allocation10]   ;;  %s3713_s26 = scalar_lea.hbm %s4486_s7, 8192 }
  0x56   : > { %s311_s23 = sshll.u32 %s3886_s22, 4  ;;  %p3714_p11 = scmp.ne.s32.totalorder %s4486_s7, %s3713_s26  ;;  %s312_s23 = int_to_ptr.vmem [resolvable:$true] %s311_s23 }
  0x57   : > { %p3720_p12 = scmp.lt.u32.totalorder %s3713_s26, %s4486_s7 }
  0x58   : > { %p3716_p1 = pnand %p3714_p11, %p4003_p8 }
  0x5a   : > { %p3717_p3 = pneg %p3716_p1 }
  0x5c   : > { %p3722_p13 = pnand %p3720_p12, %p3717_p3 }
  0x5e   : > { %3725 = shalt.err (!%p3722_p13)
}
  0x5f   : > { %s3726_s21 = scalar_lea.vmem %s312_s23, 8192  ;;  %p3734_p7 = scmp.lt.s32.totalorder %s312_s23, %s312_s23 }
  0x60   : > { %p3727_p0 = scmp.ne.s32.totalorder %s312_s23, %s3726_s21  ;;  %p3735_p9 = scmp.lt.s32.totalorder %s3726_s21, %s3726_s21 }
  0x62   : > { %p3729_p2 = pnand %p3727_p0, %p4003_p8  ;;  %p3736_p4 = por %p3735_p9, %p3734_p7 }
  0x64   : > { %p3730_p5 = pneg %p3729_p2 }
  0x66   : > { %p3737_p10 = pnand %p3736_p4, %p3730_p5 }
  0x68   : > { %3740 = shalt.err (!%p3737_p10)
}
  0x69   : > { %s3887_s18 = smov 512   ;;  %s3888_s20 = smov 32  }
  0x6a   : > { %3420 = dma.hbm_to_vmem [thread:$0]  (!%p3987_p6), %s4486_s7, 8192, %s312_s23, [#allocation9], %s3887_s18, %s3887_s18, %s3888_s20  }
  0x6b   : > { %s3889_s25 = smov [#allocation11]   ;;  %s3741_s13 = scalar_lea.hbm %s4487_s8, 4096 }
  0x6c   : > { %s324_s26 = sshll.u32 %s3889_s25, 4  ;;  %p3742_p11 = scmp.ne.s32.totalorder %s4487_s8, %s3741_s13  ;;  %s325_s26 = int_to_ptr.vmem [resolvable:$true] %s324_s26 }
  0x6d   : > { %p3748_p12 = scmp.lt.u32.totalorder %s3741_s13, %s4487_s8 }
  0x6e   : > { %p3744_p1 = pnand %p3742_p11, %p4003_p8 }
  0x70   : > { %p3745_p3 = pneg %p3744_p1 }
  0x72   : > { %p3750_p13 = pnand %p3748_p12, %p3745_p3 }
  0x74   : > { %3753 = shalt.err (!%p3750_p13)
}
  0x75   : > { %s3754_s23 = scalar_lea.vmem %s325_s26, 4096  ;;  %p3762_p7 = scmp.lt.s32.totalorder %s325_s26, %s325_s26 }
  0x76   : > { %p3755_p0 = scmp.ne.s32.totalorder %s325_s26, %s3754_s23  ;;  %p3763_p9 = scmp.lt.s32.totalorder %s3754_s23, %s3754_s23 }
  0x78   : > { %p3757_p2 = pnand %p3755_p0, %p4003_p8  ;;  %p3764_p4 = por %p3763_p9, %p3762_p7 }
  0x7a   : > { %p3758_p5 = pneg %p3757_p2 }
  0x7c   : > { %p3765_p10 = pnand %p3764_p4, %p3758_p5 }
  0x7e   : > { %3768 = shalt.err (!%p3765_p10)
}
  0x7f   : > { %s4499_s18 = smov 4   ;;  %s4500_s20 = smov 64  }
  0x80   : > { %3423 = dma.hbm_to_vmem [thread:$0]  (!%p3987_p6), %s4487_s8, 4096, %s325_s26, [#allocation12], %s4500_s20, %s4500_s20, %s4499_s18  }
  0x81   : > { %s3030_s19 = sadd.s32 4294967294, %s3877_s12   ;;  %s4110_s27 = sadd.s32 1, %s3877_s12  }
  0x82   : > { %s35_s22 = sadd.s32 1, %s3873_s11  ;;  %s32_s24 = ssub.s32 %s3877_s12, %s4110_s27 }
  0x83   : > { %p42_p8 = scmp.ne.s32.totalorder %s3873_s11, %s3869_s10  ;;  %p33_p11 = scmp.eq.s32.totalorder %s32_s24, 0 }
  0x84   : > { %p43_p1 = scmp.eq.s32.totalorder %s3877_s12, 0  ;;  %p48_p3 = scmp.ne.s32.totalorder %s3869_s10, %s3865_s30 }
  0x85   : > { %p240_p12 = scmp.eq.s32.totalorder %s3971_s15, 1  ;;  %p4501_p0 = scmp.eq.s32.totalorder %s3971_s15, 0 }
  0x86   : > { %s4122_s25 = scalar_select %p33_p11, %s3873_s11, %s35_s22  }
  0x87   : > { %p44_p13 = por %p43_p1, %p42_p8  ;;  %p4126_p2 = por %p4501_p0, %p48_p3 }
  0x88   : > { %p4130_p6 = por %p240_p12, %p42_p8  ;;  %p246_p5 = scmp.eq.s32.totalorder %s3030_s19, 1 }
  0x89   : > { %p3437_p7 = scmp.lt.s32.totalorder %s3877_s12, 2  ;;  %s338_s29 = sand.u32 1, %s3873_s11  }
  0x8a   : > { %s4503_s26 = scalar_select %p4130_p6, 1, 0 }
  0x8b   : > { %p4136_p9 = por %p246_p5, %p48_p3  ;;  %s3038_s14 = sshll.u32 %s338_s29, 3 }
  0x8c   : > { %s3039_s21 = sshll.u32 %s3877_s12, 7  ;;  %s342_s17 = scalar_lea.vmem [#allocation2], %s3038_s14 }
  0x8d   : > { %s4504_s13 = scalar_select %p4136_p9, 1, 0 }
  0x8e   : > { %s4144_s20 = scalar_lea.hbm %s4479_s0, %s3039_s21  ;;  %s349_s9 = sshll.u32 %s342_s17, 4  ;;  %s4150_s9 = int_to_ptr.vmem [resolvable:$true] %s349_s9 }
  0x8f   : > { %p4146_p4 = pnand %p3437_p7, %p44_p13  ;;  %s339_s22 = scalar_lea.sflag [#allocation3], %s338_s29 }
  0x90   : > { %s3769_s24 = scalar_lea.hbm %s4144_s20, 128  ;;  %s3774_s23 = scalar_lea.hbm %s4479_s0, 256 }
  0x91   : > { %p3770_p10 = scmp.ne.s32.totalorder %s4144_s20, %s3769_s24  ;;  %p3771_p8 = pneg %p4146_p4 }
  0x92   : > { %p3775_p3 = scmp.lt.u32.totalorder %s4144_s20, %s4479_s0  ;;  %p3776_p12 = scmp.lt.u32.totalorder %s3774_s23, %s3769_s24 }
  0x93   : > { %p3772_p11 = pnand %p3771_p8, %p3770_p10  ;;  %p3778_p0 = scmp.lt.u32.totalorder %s3769_s24, %s4144_s20 }
  0x94   : > { %p3777_p13 = por %p3776_p12, %p3775_p3 }
  0x95   : > { %p3773_p1 = pneg %p3772_p11 }
  0x96   : > { %p3779_p5 = por %p3778_p0, %p3777_p13 }
  0x98   : > { %p3780_p7 = pnand %p3779_p5, %p3773_p1 }
  0x9a   : > { %3783 = shalt.err (!%p3780_p7)
}
  0x9b   : > { %s3784_s29 = scalar_lea.vmem %s4150_s9, 128  ;;  %s3890_s21 = smov [#allocation2]  }
  0x9c   : > { %p3785_p10 = scmp.ne.s32.totalorder %s4150_s9, %s3784_s29  ;;  %s3789_s14 = sshll.u32 %s3890_s21, 4  ;;  %s3790_s14 = int_to_ptr.vmem [resolvable:$false] %s3789_s14 }
  0x9d   : > { %s3791_s18 = scalar_lea.vmem %s3790_s14, 256  ;;  %p3792_p6 = scmp.lt.s32.totalorder %s4150_s9, %s3790_s14 }
  0x9e   : > { %p3787_p11 = pnand %p3785_p10, %p3771_p8  ;;  %p3793_p3 = scmp.lt.s32.totalorder %s3791_s18, %s3784_s29 }
  0xa0   : > { %p3788_p9 = pneg %p3787_p11  ;;  %p3794_p12 = por %p3793_p3, %p3792_p6 }
  0xa2   : > { %p3795_p13 = pnand %p3794_p12, %p3788_p9 }
  0xa4   : > { %3798 = shalt.err (!%p3795_p13)
}
  0xa5   : > { %3427 = dma.hbm_to_vmem [thread:$0]  (!%p4146_p4), %s4144_s20, 128, %s4150_s9, %s339_s22  }
  0xa6   : > { %p4506_p1 = scmp.ne.s32.totalorder %s4496_s16, 0 }
  0xa7   : > { %s4180_s24 = sand.u32 (!%p4506_p1), 1, %s3869_s10  }
  0xa8   : > { %358 = sbr.rel (%p4506_p1) target bundleno = 2652 (0xa5c), region = 56  ;;  %s3041_s23 = sshll.u32 (!%p4506_p1), %s4180_s24, 3 }
  0xa9   : > { %s361_s17 = scalar_lea.sflag (!%p4506_p1), [#allocation3], %s4180_s24  ;;  %s4186_s29 = scalar_lea.vmem (!%p4506_p1), [#allocation2], %s3041_s23 }
  0xaf   : > { %3844 = dma.done.wait (%p4126_p2), %s361_s17, 128  }
  0xb0   : > { %3846 = vsyncadd (%p4126_p2), %s361_s17, 4294967168  ;;  %p4507_p6 = scmp.eq.s32.totalorder %s3971_s15, 0 }
  0xb2   : > { %3848 = dma.done.wait (%p4507_p6), [#allocation6], 5248   ;;  %p4508_p9 = pmov %p4507_p6 }
  0xb3   : > { %p4509_p4 = pmov %p4507_p6 }
  0xb4   : > { %3850 = vsyncadd (%p4508_p9), [#allocation6], 4294962048 }
  0xb5   : > { %3852 = dma.done.wait (%p4509_p4), [#allocation9], 9216   ;;  %p4510_p8 = pmov %p4509_p4 }
  0xb6   : > { %p4511_p0 = pmov %p4509_p4 }
  0xb7   : > { %3854 = vsyncadd (%p4510_p8), [#allocation9], 4294958080 }
  0xb8   : > { %3856 = dma.done.wait (%p4511_p0), [#allocation12], 4096   ;;  %p4512_p5 = pmov %p4511_p0 }
  0xb9   : > { %v4205_v0 = vld [vmem:[%s4186_s29] sm:$0xff]  ;;  %v3498_v3 = vld [vmem:[#allocation5 + $0xc] ss:$20 sps:$4 sm:$0xff]   ;;  %v3891_v35 = vmov 0   ;;  %v3892_v38 = vmov 0.0   ;;  %vm3893_vm0 = vmmov 0  }
  0xba   : > { %3858 = vsyncadd (%p4512_p5), [#allocation12], 4294963200  ;;  %422 = vadd.xlane.f32.xlu0 %v4205_v0  ;;  %v3495_v1 = vld [vmem:[#allocation5 + $0x4] ss:$20 sps:$4 sm:$0xff]   ;;  %v3497_v2 = vld [vmem:[#allocation5] ss:$20 sps:$4 sm:$0xff]   ;;  %739 = vmatprep.subr.bf16.mxu1 %v3498_v3 }
  0xbb   : > { %v3500_v4 = vld [vmem:[#allocation5 + $0x8] ss:$20 sps:$4 sm:$0xff]   ;;  %v3501_v5 = vld [vmem:[#allocation5 + $0x2c] ss:$20 sps:$4 sm:$0xff]   ;;  %698 = vmatprep.subr.bf16.mxu0 %v3495_v1  ;;  %v3506_v8 = vld [vmem:[#allocation5 + $0x30] ss:$20 sps:$4 sm:$0xff]   ;;  %730 = vmatprep.mubr.bf16.mxu0 %v3891_v35 }
  0xbc   : > { %v3504_v6 = vld [vmem:[#allocation5 + $0x34] ss:$20 sps:$4 sm:$0xff]   ;;  %699 = vmatpush1.bf16.msra.mxu0 %v3497_v2  ;;  %740 = vmatpush1.bf16.msra.mxu1 %v3500_v4  ;;  %v3510_v10 = vld [vmem:[#allocation5 + $0x5c] ss:$20 sps:$4 sm:$0xff]   ;;  %v3512_v12 = vld [vmem:[#allocation5 + $0x58] ss:$20 sps:$4 sm:$0xff]  }
  0xbd   : > { %v3503_v7 = vld [vmem:[#allocation5 + $0x28] ss:$20 sps:$4 sm:$0xff]   ;;  %700 = vmatprep.subr.bf16.mxu0 %v3501_v5  ;;  %741 = vmatprep.subr.bf16.mxu1 %v3504_v6  ;;  %v3509_v11 = vld [vmem:[#allocation5 + $0x50] ss:$20 sps:$4 sm:$0xff]   ;;  %v3515_v15 = vld [vmem:[#allocation5 + $0x78] ss:$20 sps:$4 sm:$0xff]  }
  0xbe   : > { %v3507_v9 = vld [vmem:[#allocation5 + $0x54] ss:$20 sps:$4 sm:$0xff]   ;;  %v3513_v13 = vld [vmem:[#allocation5 + $0x7c] ss:$20 sps:$4 sm:$0xff]   ;;  %v3516_v14 = vld [vmem:[#allocation5 + $0x84] ss:$20 sps:$4 sm:$0xff]   ;;  %771 = vmatprep.mubr.bf16.mxu1 %v3891_v35 }
  0xbf   : > { %v3518_v20 = vld [vmem:[#allocation5 + $0x80] ss:$20 sps:$4 sm:$0xff]   ;;  %v3519_v21 = vld [vmem:[#allocation5 + $0xa4] ss:$20 sps:$4 sm:$0xff]   ;;  %v3524_v24 = vld [vmem:[#allocation5 + $0xa8] ss:$20 sps:$4 sm:$0xff]  }
  0xc0   : > { %701 = vmatpush1.bf16.msra.mxu0 %v3503_v7  ;;  %742 = vmatpush1.bf16.msra.mxu1 %v3506_v8  ;;  %v3521_v22 = vld [vmem:[#allocation5 + $0xa0] ss:$20 sps:$4 sm:$0xff]   ;;  %v3527_v26 = vld [vmem:[#allocation5 + $0xc8] ss:$20 sps:$4 sm:$0xff]   ;;  %v3530_v28 = vld [vmem:[#allocation5 + $0xd0] ss:$20 sps:$4 sm:$0xff]  }
  0xc1   : > { %702 = vmatprep.subr.bf16.mxu0 %v3507_v9  ;;  %743 = vmatprep.subr.bf16.mxu1 %v3510_v10  ;;  %v3522_v23 = vld [vmem:[#allocation5 + $0xac] ss:$20 sps:$4 sm:$0xff]   ;;  %v3528_v27 = vld [vmem:[#allocation5 + $0xd4] ss:$20 sps:$4 sm:$0xff]   ;;  %v3534_v30 = vld [vmem:[#allocation5 + $0xfc] ss:$20 sps:$4 sm:$0xff]  }
  0xc2   : > { %v3525_v25 = vld [vmem:[#allocation5 + $0xcc] ss:$20 sps:$4 sm:$0xff]   ;;  %v3531_v29 = vld [vmem:[#allocation5 + $0xf4] ss:$20 sps:$4 sm:$0xff]   ;;  %v3533_v31 = vld [vmem:[#allocation5 + $0xf0] ss:$20 sps:$4 sm:$0xff]  }
  0xc3   : > { %v3536_v32 = vld [vmem:[#allocation5 + $0xf8] ss:$20 sps:$4 sm:$0xff]   ;;  %v3537_v33 = vld [vmem:[#allocation5 + $0x11c] ss:$20 sps:$4 sm:$0xff]   ;;  %v3542_v37 = vld [vmem:[#allocation5 + $0x120] ss:$20 sps:$4 sm:$0xff]  }
  0xc4   : > { %703 = vmatpush1.bf16.msra.mxu0 %v3509_v11  ;;  %744 = vmatpush1.bf16.msra.mxu1 %v3512_v12  ;;  %v3540_v34 = vld [vmem:[#allocation5 + $0x124] ss:$20 sps:$4 sm:$0xff]   ;;  %v3048_v42 = vld [vmem:[%s4480_s1] ss:$0 sm:$0xff]  ;;  %v3545_v49 = vld [vmem:[#allocation5 + $0x60] ss:$20 sps:$4 sm:$0xff]  }
  0xc5   : > { %704 = vmatprep.subr.bf16.mxu0 %v3513_v13  ;;  %745 = vmatprep.subr.bf16.mxu1 %v3516_v14  ;;  %v3539_v36 = vld [vmem:[#allocation5 + $0x118] ss:$20 sps:$4 sm:$0xff]   ;;  %v437_v43 = vmul.f32 %v3048_v42, %v4205_v0  ;;  %v3543_v46 = vld [vmem:[#allocation5 + $0x10] ss:$20 sps:$4 sm:$0xff]   ;;  %v3546_v50 = vld [vmem:[#allocation5 + $0x88] ss:$20 sps:$4 sm:$0xff]   ;;  %v843_v13 = vlaneseq }
  0xc6   : > { %v3544_v48 = vld [vmem:[#allocation5 + $0x38] ss:$20 sps:$4 sm:$0xff]   ;;  %v3547_v51 = vld [vmem:[#allocation5 + $0xb0] ss:$20 sps:$4 sm:$0xff]   ;;  %v3549_v53 = vld [vmem:[#allocation5 + $0x100] ss:$20 sps:$4 sm:$0xff]  }
  0xc7   : > { %v3548_v52 = vld [vmem:[#allocation5 + $0xd8] ss:$20 sps:$4 sm:$0xff]   ;;  %v3550_v54 = vld [vmem:[#allocation5 + $0x128] ss:$20 sps:$4 sm:$0xff]   ;;  %v820_v55 = vld [vmem:[#allocation7] sm:$0xff]  ;;  %s3894_s19 = smov 32  }
  0xc8   : > { %705 = vmatpush1.bf16.msra.mxu0 %v3515_v15  ;;  %746 = vmatpush1.bf16.msra.mxu1 %v3518_v20  ;;  %v821_v56 = vld [vmem:[%s4483_s4] sm:$0xff]  ;;  %s3895_s22 = smov 96   ;;  %s3896_s21 = smov 64   ;;  %v3897_v11 = vmov 1983009808   ;;  %vm1278_vm1 = vcmask 261120  }
  0xc9   : > { %706 = vmatprep.subr.bf16.mxu0 %v3519_v21  ;;  %747 = vmatprep.subr.bf16.mxu1 %v3522_v23  ;;  %v841_v12 = vunpack.c.l.s4 %v3897_v11  ;;  %v3898_v14 = vmov 1934713408   ;;  %vm1511_vm2 = vcmask 1043456   ;;  %vm1463_vm3 = vcmask 64512   ;;  %s3215_s16 = sshll.u32 %s3971_s15, 7  ;;  %s418_s28 = scalar_lea.vmem [#allocation13], %s3041_s23 }
  0xca   : > { %v873_v15 = vunpack.c.l.s4 %v3898_v14  ;;  %vm1846_vm4 = vcmask 523264   ;;  %vm1848_vm5 = vcmask 785408   ;;  %s2912_s20 = sshll.u32 %s418_s28, 4  ;;  %s2899_s14 = scalar_lea.sflag [#allocation4], %s4180_s24  ;;  %s4437_s20 = int_to_ptr.vmem [resolvable:$true] %s2912_s20 }
  0xcb   : > { %s3799_s18 = scalar_lea.vmem %s4437_s20, 128  ;;  %p4514_p7 = scmp.ne.s32.totalorder %s4503_s26, 0 }
  0xcc   : > { %707 = vmatpush1.bf16.msra.mxu0 %v3521_v22  ;;  %748 = vmatpush1.bf16.msra.mxu1 %v3524_v24  ;;  %v874_v20 = vunpack.c.0.s8 %v873_v15  ;;  %p3800_p2 = scmp.ne.s32.totalorder %s4437_s20, %s3799_s18  ;;  %s3899_s15 = smov [#allocation13]  }
  0xcd   : > { %708 = vmatprep.subr.bf16.mxu0 %v3525_v25  ;;  %749 = vmatprep.subr.bf16.mxu1 %v3528_v27  ;;  %s3803_s23 = sshll.u32 %s3899_s15, 4  ;;  %s3804_s23 = int_to_ptr.vmem [resolvable:$false] %s3803_s23 }
  0xce   : > { %p3801_p10 = pnand %p3800_p2, %p4514_p7  ;;  %s3805_s17 = scalar_lea.vmem %s3804_s23, 256 }
  0xcf   : > { %p3806_p3 = scmp.lt.s32.totalorder %s4437_s20, %s3804_s23  ;;  %p3807_p12 = scmp.lt.s32.totalorder %s3805_s17, %s3799_s18 }
  0xd0   : > { %709 = vmatpush1.bf16.msra.mxu0 %v3527_v26  ;;  %750 = vmatpush1.bf16.msra.mxu1 %v3530_v28  ;;  %p3802_p11 = pneg %p3801_p10 }
  0xd1   : > { %710 = vmatprep.subr.bf16.mxu0 %v3531_v29  ;;  %751 = vmatprep.subr.bf16.mxu1 %v3534_v30  ;;  %p3808_p13 = por %p3807_p12, %p3806_p3 }
  0xd3   : > { %p3809_p1 = pnand %p3808_p13, %p3802_p11 }
  0xd4   : > { %711 = vmatpush1.bf16.msra.mxu0 %v3533_v31  ;;  %752 = vmatpush1.bf16.msra.mxu1 %v3536_v32 }
  0xd5   : > { %712 = vmatprep.subr.bf16.mxu0 %v3537_v33  ;;  %753 = vmatprep.subr.bf16.mxu1 %v3540_v34 }
  0xd8   : > { %713 = vmatpush1.bf16.msra.mxu0 %v3539_v36  ;;  %754 = vmatpush1.bf16.msra.mxu1 %v3542_v37 }
  0xd9   : > { %3296 = vmatprep.subr.bf16.mxu0 %v3892_v38  ;;  %3316 = vmatprep.subr.bf16.mxu1 %v3892_v38 }
 0x147   : > { %v423_v16 = vpop.xlane.xlu0 %422 }
 0x148   : > { %v425_v17 = vmul.f32 0.0078125, %v423_v16  ;;  %v842_v16 = vunpack.c.0.s8 %v841_v12 }
 0x14a   : > { %v426_v18 = vsub.f32 %v4205_v0, %v425_v17  ;;  %v844_v17 = vshrl.u32 %v843_v13, 7 }
 0x14c   : > { %v427_v19 = vmul.f32 %v426_v18, %v426_v18  ;;  %v4253_v21 = vsub.s32 %v842_v16, %v844_v17  ;;  %v4255_v28 = vsub.s32 %v874_v20, %v844_v17 }
 0x14e   : > { %428 = vadd.xlane.f32.xlu0 %v427_v19 }
 0x1db   : > { %v429_v39 = vpop.xlane.xlu0 %428 }
 0x1dc   : > { %v430_v40 = vmul.f32 0.0078125, %v429_v39 }
 0x1de   : > { %v438_v41 = vadd.f32 1e-08, %v430_v40 }
 0x1e0   : > { %3591 = vrsqrt.f32 %v438_v41 }
 0x1ea   : > { %v3592_v44 = vpop.eup %3591 }
 0x1eb   : > { %v440_v45 = vmul.f32 %v3592_v44, %v437_v43 }
 0x1ed   : > { %v441_v47 = vpack.c.bf16 %v440_v45, %v440_v45 }
 0x1ef   : > { %731 = vmatmul.mubr.bf16.vlgmr.msra.gmra.mrb[0].mxu0 %v441_v47  ;;  %772 = vmatmul.mubr.bf16.vlgmr.msra.gmra.mrb[0].mxu1 %v441_v47 }
 0x1f0   : > { %3297 = vmatpush3.bf16.msra.mxu0 %v3543_v46  ;;  %3312 = vmatprep.mubr.msk.bf16.mxu0 %vm3893_vm0, %v3892_v38 }
 0x1f1   : > { %3298 = vmatprep.subr.bf16.mxu0 %v3892_v38  ;;  %3318 = vmatprep.mubr.msk.bf16.mxu1 %vm3893_vm0, %v3892_v38 }
 0x1f4   : > { %3299 = vmatpush3.bf16.msra.mxu0 %v3544_v48 }
 0x1f5   : > { %3300 = vmatprep.subr.bf16.mxu0 %v3892_v38 }
 0x1f8   : > { %3301 = vmatpush3.bf16.msra.mxu0 %v3545_v49 }
 0x1f9   : > { %3302 = vmatprep.subr.bf16.mxu0 %v3892_v38 }
 0x1fc   : > { %3303 = vmatpush3.bf16.msra.mxu0 %v3546_v50 }
 0x1fd   : > { %3304 = vmatprep.subr.bf16.mxu0 %v3892_v38 }
 0x200   : > { %3305 = vmatpush3.bf16.msra.mxu0 %v3547_v51 }
 0x201   : > { %3306 = vmatprep.subr.bf16.mxu0 %v3892_v38 }
 0x204   : > { %3307 = vmatpush3.bf16.msra.mxu0 %v3548_v52 }
 0x205   : > { %3308 = vmatprep.subr.bf16.mxu0 %v3892_v38 }
 0x208   : > { %3309 = vmatpush3.bf16.msra.mxu0 %v3549_v53 }
 0x209   : > { %3310 = vmatprep.subr.bf16.mxu0 %v3892_v38 }
 0x20c   : > { %3311 = vmatpush3.bf16.msra.mxu0 %v3550_v54 }
 0x20d   : > { %3364 = vmatprep.subr.bf16.mxu0 %v3892_v38 }
 0x20f   : > { %3313 = vmatmul.mubr.bf16.vlgmr.msra.gmra.mrb[4].mxu0 %v441_v47 }
 0x210   : > { %3380 = vmatprep.mubr.msk.bf16.mxu0 %vm3893_vm0, %v3892_v38 }
 0x2c2   : > { %v732_v57 = vpop.f32.mrb[0].mxu0  ;;  %v4234_v58 = vpop.f32.mrb[0].mxu1 }
 0x2c3   : > { %v822_v59 = vmul.f32 %v820_v55, %v732_v57  ;;  %v734_v60 = vpop.f32.mrb[1].mxu0  ;;  %v775_v61 = vpop.f32.mrb[1].mxu1 }
 0x2c4   : > { %v823_v62 = vmul.f32 %v821_v56, %v775_v61  ;;  %v736_v63 = vpop.f32.mrb[2].mxu0  ;;  %v777_v0 = vpop.f32.mrb[2].mxu1  ;;  %v825_v5 = vmul.f32 %v820_v55, %v734_v60 }
 0x2c5   : > { %v737_v1 = vpop.f32.mrb[3].mxu0  ;;  %v778_v2 = vpop.f32.mrb[3].mxu1 }
 0x2c6   : > { %v4236_v3 = vadd.f32 %v823_v62, %v822_v59 }
 0x2e2   : > { %v814_v4 = vpop.f32.mrb[4].mxu0 }
 0x2e3   : > { %v826_v6 = vmul.f32 %v821_v56, %v814_v4  ;;  %v3314_v7 = vpop.f32.mrb[5].mxu0 }
 0x2e4   : > { %v817_v8 = vpop.f32.mrb[6].mxu0 }
 0x2e5   : > { %v827_v9 = vadd.f32 %v826_v6, %v825_v5  ;;  %v3315_v10 = vpop.f32.mrb[7].mxu0 }
 0x2e7   : > { %985 = vrot.lane.b32.xlu0 %v827_v9, %s3894_s19  ;;  %979 = vrot.lane.b32.xlu1 %v827_v9, %s3895_s22 }
 0x2eb   : > { %1129 = vrot.lane.b32.xlu0 %v4234_v58, %s3895_s22  ;;  %982 = vrot.lane.b32.xlu1 %v827_v9, %s3896_s21 }
 0x2ef   : > { %1132 = vrot.lane.b32.xlu0 %v4234_v58, %s3896_s21  ;;  %829 = vrot.lane.b32.xlu1 %v4236_v3, %s3895_s22 }
 0x2f3   : > { %1135 = vrot.lane.b32.xlu0 %v4234_v58, %s3894_s19  ;;  %832 = vrot.lane.b32.xlu1 %v4236_v3, %s3896_s21 }
 0x2f7   : > { %835 = vrot.lane.b32.xlu1 %v4236_v3, %s3894_s19 }
 0x359   : > { %v986_v18 = vpop.permute.xlu0 %985  ;;  %v980_v19 = vpop.permute.xlu1 %979 }
 0x35a   : > { %v1004_v22 = vcombine.low %v980_v19, %v986_v18  ;;  %v1005_v23 = vcombine.high %v980_v19, %v986_v18 }
 0x35c   : > { %v1012_v29 = vrot.slane %v1004_v22, %v4253_v21  ;;  %v1019_v30 = vrot.slane %v1005_v23, %v4253_v21 }
 0x35d   : > { %v1130_v24 = vpop.permute.xlu0 %1129  ;;  %v983_v25 = vpop.permute.xlu1 %982 }
 0x35e   : > { %v988_v26 = vcombine.low %v827_v9, %v983_v25  ;;  %v989_v27 = vcombine.high %v827_v9, %v983_v25 }
 0x360   : > { %v996_v31 = vrot.slane %v988_v26, %v4253_v21  ;;  %v1003_v32 = vrot.slane %v989_v27, %v4253_v21 }
 0x361   : > { %v1133_v33 = vpop.permute.xlu0 %1132  ;;  %v830_v34 = vpop.permute.xlu1 %829 }
 0x362   : > { %v1020_v36 = vcombine.low %v996_v31, %v1012_v29  ;;  %v1021_v37 = vcombine.high %v996_v31, %v1012_v29  ;;  %v1036_v39 = vcombine.low %v1003_v32, %v1019_v30  ;;  %v1037_v40 = vcombine.high %v1003_v32, %v1019_v30 }
 0x363   : > { %v1138_v45 = vcombine.low %v4234_v58, %v1133_v33  ;;  %v1139_v46 = vcombine.high %v4234_v58, %v1133_v33 }
 0x364   : > { %v1028_v41 = vrot.slane %v1020_v36, %v4255_v28  ;;  %v1035_v42 = vrot.slane %v1021_v37, %v4255_v28  ;;  %v1044_v43 = vrot.slane %v1036_v39, %v4255_v28  ;;  %v1051_v44 = vrot.slane %v1037_v40, %v4255_v28 }
 0x365   : > { %v1136_v47 = vpop.permute.xlu0 %1135  ;;  %v833_v48 = vpop.permute.xlu1 %832  ;;  %v1146_v61 = vrot.slane %v1138_v45, %v4253_v21  ;;  %v1153_v62 = vrot.slane %v1139_v46, %v4253_v21 }
 0x366   : > { %v1056_v49 = vcombine.low %v1028_v41, %v1035_v42  ;;  %v3091_v50 = vcombine.high %v1028_v41, %v1035_v42  ;;  %v1072_v51 = vcombine.low %v1044_v43, %v1051_v44  ;;  %v3092_v52 = vcombine.high %v1044_v43, %v1051_v44 }
 0x367   : > { %v1154_v53 = vcombine.low %v1130_v24, %v1136_v47  ;;  %v1155_v54 = vcombine.high %v1130_v24, %v1136_v47  ;;  %v838_v55 = vcombine.low %v4236_v3, %v833_v48  ;;  %v839_v56 = vcombine.high %v4236_v3, %v833_v48 }
 0x368   : > { %v4270_v57 = vrot.slane %v1056_v49, %v4253_v21  ;;  %v4273_v59 = vrot.slane %v3091_v50, %v4253_v21  ;;  %v4276_v58 = vrot.slane %v1072_v51, %v4253_v21  ;;  %v4279_v60 = vrot.slane %v3092_v52, %v4253_v21 }
 0x369   : > { %v1162_v63 = vrot.slane %v1154_v53, %v4253_v21  ;;  %v1169_v0 = vrot.slane %v1155_v54, %v4253_v21  ;;  %v836_v1 = vpop.permute.xlu1 %835  ;;  %v846_v10 = vrot.slane %v838_v55, %v4253_v21  ;;  %v853_v11 = vrot.slane %v839_v56, %v4253_v21 }
 0x36a   : > { %v854_v2 = vcombine.low %v830_v34, %v836_v1  ;;  %v855_v3 = vcombine.high %v830_v34, %v836_v1  ;;  %v1088_v4 = vcombine.low %v4270_v57, %v4273_v59  ;;  %v1104_v5 = vcombine.low %v4276_v58, %v4279_v60 }
 0x36b   : > { %v1170_v6 = vcombine.low %v1146_v61, %v1162_v63  ;;  %v1171_v7 = vcombine.high %v1146_v61, %v1162_v63  ;;  %v1186_v8 = vcombine.low %v1153_v62, %v1169_v0  ;;  %v1187_v9 = vcombine.high %v1153_v62, %v1169_v0 }
 0x36c   : > { %v862_v12 = vrot.slane %v854_v2, %v4253_v21  ;;  %v869_v13 = vrot.slane %v855_v3, %v4253_v21  ;;  %v1096_v24 = vrot.slane %v1088_v4, %v4255_v28  ;;  %v1112_v25 = vrot.slane %v1104_v5, %v4255_v28 }
 0x36d   : > { %v1178_v14 = vrot.slane %v1170_v6, %v4255_v28  ;;  %v1185_v15 = vrot.slane %v1171_v7, %v4255_v28  ;;  %v1194_v16 = vrot.slane %v1186_v8, %v4255_v28  ;;  %v1201_v17 = vrot.slane %v1187_v9, %v4255_v28 }
 0x36e   : > { %v870_v18 = vcombine.low %v846_v10, %v862_v12  ;;  %v871_v19 = vcombine.high %v846_v10, %v862_v12  ;;  %v886_v20 = vcombine.low %v853_v11, %v869_v13  ;;  %v887_v22 = vcombine.high %v853_v11, %v869_v13 }
 0x36f   : > { %v1206_v23 = vcombine.low %v1178_v14, %v1185_v15  ;;  %v3093_v31 = vcombine.high %v1178_v14, %v1185_v15  ;;  %v1222_v32 = vcombine.low %v1194_v16, %v1201_v17  ;;  %v3094_v33 = vcombine.high %v1194_v16, %v1201_v17 }
 0x370   : > { %v878_v26 = vrot.slane %v870_v18, %v4255_v28  ;;  %v885_v27 = vrot.slane %v871_v19, %v4255_v28  ;;  %v894_v29 = vrot.slane %v886_v20, %v4255_v28  ;;  %v901_v30 = vrot.slane %v887_v22, %v4255_v28 }
 0x371   : > { %v1213_v40 = vrot.slane %v1206_v23, %v4253_v21  ;;  %v1120_v41 = vcombine.low %v1096_v24, %v1112_v25  ;;  %v1221_v46 = vrot.slane %v3093_v31, %v4253_v21  ;;  %v1229_v47 = vrot.slane %v1222_v32, %v4253_v21 }
 0x372   : > { %v906_v34 = vcombine.low %v878_v26, %v885_v27  ;;  %v3089_v36 = vcombine.high %v878_v26, %v885_v27  ;;  %v922_v37 = vcombine.low %v894_v29, %v901_v30  ;;  %v3090_v39 = vcombine.high %v894_v29, %v901_v30 }
 0x373   : > { %v1237_v48 = vrot.slane %v3094_v33, %v4253_v21  ;;  %v1124_v49 = vpack.c.bf16 %v1120_v41, %v1120_v41  ;;  %v1121_v52 = vcombine.high %v1096_v24, %v1112_v25  ;;  %v1089_v54 = vcombine.high %v4270_v57, %v4273_v59 }
 0x374   : > { %v913_v42 = vrot.slane %v906_v34, %v4253_v21  ;;  %v921_v43 = vrot.slane %v3089_v36, %v4253_v21  ;;  %v929_v44 = vrot.slane %v922_v37, %v4253_v21  ;;  %v937_v45 = vrot.slane %v3090_v39, %v4253_v21 }
 0x375   : > { %v1283_v53 = vsel %vm1278_vm1, %v1124_v49, 0  ;;  %v1105_v55 = vcombine.high %v4276_v58, %v4279_v60  ;;  %v1238_v62 = vcombine.low %v1213_v40, %v1221_v46  ;;  %v1254_v63 = vcombine.low %v1229_v47, %v1237_v48 }
 0x376   : > { %v938_v50 = vcombine.low %v913_v42, %v921_v43  ;;  %v954_v51 = vcombine.low %v929_v44, %v937_v45  ;;  %3317 = vmatpush3.bf16.xpose.msra.mxu1 %v1283_v53  ;;  %v1125_v1 = vpack.c.bf16 %v1121_v52, %v1121_v52  ;;  %v1103_v2 = vrot.slane %v1089_v54, %v4255_v28 }
 0x377   : > { %3322 = vmatprep.subr.bf16.mxu1 %v3892_v38  ;;  %v1119_v3 = vrot.slane %v1105_v55, %v4255_v28  ;;  %v1246_v57 = vrot.slane %v1238_v62, %v4255_v28  ;;  %v1262_v59 = vrot.slane %v1254_v63, %v4255_v28  ;;  %v1239_v4 = vcombine.high %v1213_v40, %v1221_v46 }
 0x378   : > { %v946_v56 = vrot.slane %v938_v50, %v4255_v28  ;;  %v962_v61 = vrot.slane %v954_v51, %v4255_v28  ;;  %v1255_v5 = vcombine.high %v1229_v47, %v1237_v48  ;;  %v1329_v6 = vsel %vm1278_vm1, %v1125_v1, 0 }
 0x379   : > { %v1271_v60 = vcombine.high %v1246_v57, %v1262_v59  ;;  %v1122_v7 = vcombine.low %v1103_v2, %v1119_v3  ;;  %v1253_v9 = vrot.slane %v1239_v4, %v4255_v28  ;;  %v939_v11 = vcombine.high %v913_v42, %v921_v43 }
 0x37a   : > { %v970_v0 = vcombine.low %v946_v56, %v962_v61  ;;  %v1269_v10 = vrot.slane %v1255_v5, %v4255_v28  ;;  %v955_v12 = vcombine.high %v929_v44, %v937_v45  ;;  %v971_v13 = vcombine.high %v946_v56, %v962_v61 }
 0x37b   : > { %v1275_v8 = vpack.c.bf16 %v1271_v60, %v1271_v60  ;;  %v1126_v17 = vpack.c.bf16 %v1122_v7, %v1122_v7  ;;  %v953_v20 = vrot.slane %v939_v11, %v4255_v28  ;;  %v1123_v27 = vcombine.high %v1103_v2, %v1119_v3 }
 0x37c   : > { %v974_v58 = vpack.c.bf16 %v970_v0, %v970_v0  ;;  %v1272_v15 = vcombine.low %v1253_v9, %v1269_v10  ;;  %v1273_v16 = vcombine.high %v1253_v9, %v1269_v10  ;;  %v975_v22 = vpack.c.bf16 %v971_v13, %v971_v13 }
 0x37d   : > { %v4331_v14 = vsel %vm1511_vm2, %v1275_v8, 0  ;;  %v969_v23 = vrot.slane %v955_v12, %v4255_v28  ;;  %v1375_v26 = vsel %vm1278_vm1, %v1126_v17, 0  ;;  %v1127_v30 = vpack.c.bf16 %v1123_v27, %v1123_v27 }
 0x37e   : > { %3319 = vmatmul.mubr.msk.bf16.vlgmr.msra.gmra.mrb[4].mxu1 %vm1278_vm1, %v974_v58  ;;  %v1276_v18 = vpack.c.bf16 %v1272_v15, %v1272_v15  ;;  %v1277_v19 = vpack.c.bf16 %v1273_v16, %v1273_v16  ;;  %v1270_v33 = vcombine.low %v1246_v57, %v1262_v59 }
 0x37f   : > { %3323 = vmatpush3.bf16.xpose.msra.mxu1 %v1329_v6  ;;  %3324 = vmatprep.mubr.msk.bf16.mxu1 %vm3893_vm0, %v3892_v38  ;;  %v972_v29 = vcombine.low %v953_v20, %v969_v23  ;;  %v1421_v32 = vsel %vm1278_vm1, %v1127_v30, 0  ;;  %v973_v34 = vcombine.high %v953_v20, %v969_v23  ;;  %v3551_v20 = vld [vmem:[#allocation8] sm:$0xff]   ;;  %v3553_v23 = vld [vmem:[#allocation8 + $0x10] sm:$0xff]  }
 0x380   : > { %3328 = vmatprep.subr.bf16.mxu1 %v3892_v38  ;;  %v4336_v24 = vsel %vm1511_vm2, %v1276_v18, 0  ;;  %v4339_v25 = vsel %vm1511_vm2, %v1277_v19, 0  ;;  %v1274_v36 = vpack.c.bf16 %v1270_v33, %v1270_v33  ;;  %3365 = vmatpush3.bf16.msra.mxu0 %v3551_v20 }
 0x381   : > { %v976_v31 = vpack.c.bf16 %v972_v29, %v972_v29  ;;  %v977_v37 = vpack.c.bf16 %v973_v34, %v973_v34  ;;  %3366 = vmatprep.subr.bf16.mxu0 %v3892_v38 }
 0x382   : > { %v1513_v39 = vsel %vm1511_vm2, %v1274_v36, 0 }
 0x386   : > { %3325 = vmatmul.mubr.msk.bf16.vlgmr.msra.gmra.mrb[8].mxu1 %vm1278_vm1, %v975_v22  ;;  %v3552_v22 = vld [vmem:[#allocation8 + $0x8] sm:$0xff]  }
 0x387   : > { %3329 = vmatpush3.bf16.xpose.msra.mxu1 %v1375_v26  ;;  %3330 = vmatprep.mubr.msk.bf16.mxu1 %vm3893_vm0, %v3892_v38  ;;  %v3556_v26 = vld [vmem:[#allocation8 + $0x28] sm:$0xff]  }
 0x388   : > { %3334 = vmatprep.subr.bf16.mxu1 %v3892_v38  ;;  %3367 = vmatpush3.bf16.msra.mxu0 %v3552_v22 }
 0x389   : > { %3368 = vmatprep.subr.bf16.mxu0 %v3892_v38 }
 0x38c   : > { %3369 = vmatpush3.bf16.msra.mxu0 %v3553_v23 }
 0x38d   : > { %3370 = vmatprep.subr.bf16.mxu0 %v3892_v38 }
 0x38e   : > { %3331 = vmatmul.mubr.msk.bf16.vlgmr.msra.gmra.mrb[12].mxu1 %vm1278_vm1, %v976_v31 }
 0x38f   : > { %3335 = vmatpush3.bf16.xpose.msra.mxu1 %v1421_v32  ;;  %3336 = vmatprep.mubr.msk.bf16.mxu1 %vm3893_vm0, %v3892_v38 }
 0x390   : > { %3340 = vmatprep.subr.bf16.mxu1 %v3892_v38 }
 0x396   : > { %3337 = vmatmul.mubr.msk.bf16.vlgmr.msra.gmra.mrb[16].mxu1 %vm1278_vm1, %v977_v37 }
 0x397   : > { %3341 = vmatpush3.bf16.msra.mxu1 %v1513_v39  ;;  %3342 = vmatprep.mubr.msk.bf16.mxu1 %vm3893_vm0, %v3892_v38 }
 0x398   : > { %3346 = vmatprep.subr.bf16.mxu1 %v3892_v38 }
 0x451   : > { %v1319_v40 = vpop.f32.mrb[4].mxu1 }
 0x452   : > { %v3320_v41 = vpop.f32.mrb[5].mxu1  ;;  %v1464_v42 = vsel %vm1463_vm3, %v1319_v40, -inf }
 0x453   : > { %1465 = vmax.xlane.f32.xlu1 %v1464_v42  ;;  %v1322_v43 = vpop.f32.mrb[6].mxu1 }
 0x454   : > { %v3321_v44 = vpop.f32.mrb[7].mxu1 }
 0x459   : > { %v1365_v45 = vpop.f32.mrb[8].mxu1 }
 0x45a   : > { %v3326_v46 = vpop.f32.mrb[9].mxu1  ;;  %v1467_v47 = vsel %vm1463_vm3, %v1365_v45, -inf }
 0x45b   : > { %1468 = vmax.xlane.f32.xlu0 %v1467_v47  ;;  %v1368_v48 = vpop.f32.mrb[10].mxu1 }
 0x45c   : > { %v3327_v49 = vpop.f32.mrb[11].mxu1 }
 0x461   : > { %v1411_v50 = vpop.f32.mrb[12].mxu1 }
 0x462   : > { %v3332_v51 = vpop.f32.mrb[13].mxu1  ;;  %v1470_v52 = vsel %vm1463_vm3, %v1411_v50, -inf }
 0x463   : > { %1471 = vmax.xlane.f32.xlu1 %v1470_v52  ;;  %v1414_v53 = vpop.f32.mrb[14].mxu1 }
 0x464   : > { %v3333_v54 = vpop.f32.mrb[15].mxu1 }
 0x469   : > { %v1457_v55 = vpop.f32.mrb[16].mxu1 }
 0x46a   : > { %v3338_v56 = vpop.f32.mrb[17].mxu1  ;;  %v1473_v61 = vsel %vm1463_vm3, %v1457_v55, -inf }
 0x46b   : > { %1474 = vmax.xlane.f32.xlu1 %v1473_v61  ;;  %v1460_v62 = vpop.f32.mrb[18].mxu1 }
 0x46c   : > { %v3339_v63 = vpop.f32.mrb[19].mxu1 }
 0x4e0   : > { %v1466_v0 = vpop.xlane.xlu1 %1465 }
 0x4e1   : > { %v1476_v1 = vsub.f32 %v1319_v40, %v1466_v0 }
 0x4e3   : > { %v1480_v2 = vmul.f32 1.442695, %v1476_v1 }
 0x4e5   : > { %3593 = vpow2.f32 %v1480_v2 }
 0x4e8   : > { %v1469_v3 = vpop.xlane.xlu0 %1468 }
 0x4e9   : > { %v1477_v57 = vsub.f32 %v1365_v45, %v1469_v3 }
 0x4eb   : > { %v1482_v59 = vmul.f32 1.442695, %v1477_v57 }
 0x4ed   : > { %3595 = vpow2.f32 %v1482_v59 }
 0x4ef   : > { %v3594_v58 = vpop.eup %3593 }
 0x4f0   : > { %v1472_v60 = vpop.xlane.xlu1 %1471  ;;  %v1488_v4 = vsel %vm1463_vm3, %v3594_v58, 0.0  ;;  %v1504_v5 = vpack.c.bf16 %v3594_v58, %v3594_v58 }
 0x4f1   : > { %v1478_v6 = vsub.f32 %v1411_v50, %v1472_v60  ;;  %1489 = vadd.xlane.f32.xlu1 %v1488_v4 }
 0x4f2   : > { %3343 = vmatmul.mubr.msk.bf16.vlgmr.msra.gmra.mrb[20].mxu1 %vm1463_vm3, %v1504_v5 }
 0x4f3   : > { %v1484_v7 = vmul.f32 1.442695, %v1478_v6  ;;  %3347 = vmatpush3.bf16.msra.mxu1 %v4331_v14  ;;  %3348 = vmatprep.mubr.msk.bf16.mxu1 %vm3893_vm0, %v3892_v38  ;;  %v3557_v6 = vld [vmem:[#allocation8 + $0x30] sm:$0xff]  }
 0x4f4   : > { %3352 = vmatprep.subr.bf16.mxu1 %v3892_v38 }
 0x4f5   : > { %3597 = vpow2.f32 %v1484_v7 }
 0x4f7   : > { %v3596_v8 = vpop.eup %3595 }
 0x4f8   : > { %v1475_v9 = vpop.xlane.xlu1 %1474  ;;  %v1491_v10 = vsel %vm1463_vm3, %v3596_v8, 0.0  ;;  %v1505_v11 = vpack.c.bf16 %v3596_v8, %v3596_v8 }
 0x4f9   : > { %v1479_v12 = vsub.f32 %v1457_v55, %v1475_v9  ;;  %1492 = vadd.xlane.f32.xlu1 %v1491_v10 }
 0x4fa   : > { %3349 = vmatmul.mubr.msk.bf16.vlgmr.msra.gmra.mrb[24].mxu1 %vm1463_vm3, %v1505_v11 }
 0x4fb   : > { %v1486_v13 = vmul.f32 1.442695, %v1479_v12  ;;  %3353 = vmatpush3.bf16.msra.mxu1 %v4336_v24  ;;  %3354 = vmatprep.mubr.msk.bf16.mxu1 %vm3893_vm0, %v3892_v38  ;;  %v3554_v24 = vld [vmem:[#allocation8 + $0x18] sm:$0xff]  }
 0x4fc   : > { %3358 = vmatprep.subr.bf16.mxu1 %v3892_v38  ;;  %3371 = vmatpush3.bf16.msra.mxu0 %v3554_v24 }
 0x4fd   : > { %3599 = vpow2.f32 %v1486_v13  ;;  %3372 = vmatprep.subr.bf16.mxu0 %v3892_v38 }
 0x4ff   : > { %v3598_v14 = vpop.eup %3597 }
 0x500   : > { %v1494_v15 = vsel %vm1463_vm3, %v3598_v14, 0.0  ;;  %v1506_v16 = vpack.c.bf16 %v3598_v14, %v3598_v14 }
 0x501   : > { %1495 = vadd.xlane.f32.xlu1 %v1494_v15 }
 0x502   : > { %3355 = vmatmul.mubr.msk.bf16.vlgmr.msra.gmra.mrb[28].mxu1 %vm1463_vm3, %v1506_v16 }
 0x503   : > { %3359 = vmatpush3.bf16.msra.mxu1 %v4339_v25  ;;  %3360 = vmatprep.mubr.msk.bf16.mxu1 %vm3893_vm0, %v3892_v38  ;;  %v3555_v25 = vld [vmem:[#allocation8 + $0x20] sm:$0xff]  }
 0x504   : > { %3373 = vmatpush3.bf16.msra.mxu0 %v3555_v25 }
 0x505   : > { %3374 = vmatprep.subr.bf16.mxu0 %v3892_v38 }
 0x507   : > { %v3600_v17 = vpop.eup %3599 }
 0x508   : > { %v1497_v18 = vsel %vm1463_vm3, %v3600_v17, 0.0  ;;  %v1507_v19 = vpack.c.bf16 %v3600_v17, %v3600_v17  ;;  %3375 = vmatpush3.bf16.msra.mxu0 %v3556_v26 }
 0x509   : > { %1498 = vadd.xlane.f32.xlu0 %v1497_v18  ;;  %3376 = vmatprep.subr.bf16.mxu0 %v3892_v38 }
 0x50a   : > { %3361 = vmatmul.mubr.msk.bf16.vlgmr.msra.gmra.mrb[32].mxu1 %vm1463_vm3, %v1507_v19  ;;  %v3558_v19 = vld [vmem:[#allocation8 + $0x38] sm:$0xff]  }
 0x50b   : > { %2392 = vmatprep.mubr.bf16.mxu1 %v3891_v35 }
 0x50c   : > { %3377 = vmatpush3.bf16.msra.mxu0 %v3557_v6  ;;  %v2000_v6 = vld [vmem:[#allocation10 + $0xc0] sm:$0xff] }
 0x50d   : > { %3378 = vmatprep.subr.bf16.mxu0 %v3892_v38 }
 0x510   : > { %3379 = vmatpush3.bf16.msra.mxu0 %v3558_v19 }
 0x57e   : > { %v1490_v27 = vpop.xlane.xlu1 %1489 }
 0x57f   : > { %3601 = vrcp.f32 %v1490_v27 }
 0x586   : > { %v1493_v29 = vpop.xlane.xlu1 %1492 }
 0x589   : > { %v3602_v42 = vpop.eup %3601 }
 0x58e   : > { %v1496_v33 = vpop.xlane.xlu1 %1495 }
 0x58f   : > { %3603 = vrcp.f32 %v1496_v33 }
 0x590   : > { %3605 = vrcp.f32 %v1493_v29 }
 0x596   : > { %v1499_v40 = vpop.xlane.xlu0 %1498 }
 0x597   : > { %3607 = vrcp.f32 %v1499_v40  ;;  %v3105_v40 = vld [vmem:[%s4485_s6] ss:$0 sm:$0xff] }
 0x599   : > { %v3604_v43 = vpop.eup %3603 }
 0x59a   : > { %v3606_v52 = vpop.eup %3605 }
 0x5a1   : > { %v3608_v53 = vpop.eup %3607 }
 0x5c5   : > { %v1549_v30 = vpop.f32.mrb[20].mxu1 }
 0x5c6   : > { %v3344_v31 = vpop.f32.mrb[21].mxu1  ;;  %v1693_v45 = vmul.f32 %v3602_v42, %v1549_v30 }
 0x5c7   : > { %v1552_v32 = vpop.f32.mrb[22].mxu1 }
 0x5c8   : > { %v3345_v34 = vpop.f32.mrb[23].mxu1 }
 0x5cd   : > { %v1595_v36 = vpop.f32.mrb[24].mxu1 }
 0x5ce   : > { %v3350_v37 = vpop.f32.mrb[25].mxu1  ;;  %v1694_v55 = vmul.f32 %v3606_v52, %v1595_v36 }
 0x5cf   : > { %v1598_v39 = vpop.f32.mrb[26].mxu1 }
 0x5d0   : > { %v3351_v41 = vpop.f32.mrb[27].mxu1 }
 0x5d5   : > { %v1641_v44 = vpop.f32.mrb[28].mxu1 }
 0x5d6   : > { %v1695_v46 = vmul.f32 %v3604_v43, %v1641_v44  ;;  %v3356_v47 = vpop.f32.mrb[29].mxu1 }
 0x5d7   : > { %v1644_v48 = vpop.f32.mrb[30].mxu1 }
 0x5d8   : > { %v1697_v49 = vcombine.low %v1693_v45, %v1695_v46  ;;  %v1698_v50 = vcombine.high %v1693_v45, %v1695_v46  ;;  %v3357_v51 = vpop.f32.mrb[31].mxu1  ;;  %v3627_v45 = vld [vmem:[%s4186_s29] sm:$0xff]  ;;  %v1976_v48 = vld [vmem:[#allocation10] sm:$0xff] }
 0x5da   : > { %v1705_v2 = vrot.slane %v1697_v49, %v4253_v21  ;;  %v1712_v3 = vrot.slane %v1698_v50, %v4253_v21  ;;  %v1980_v49 = vld [vmem:[#allocation10 + $0x20] sm:$0xff]  ;;  %v1977_v50 = vld [vmem:[#allocation10 + $0x8] sm:$0xff] }
 0x5db   : > { %v3114_v51 = vcombine.low %v1976_v48, %v1980_v49  ;;  %v3115_v52 = vcombine.high %v1976_v48, %v1980_v49  ;;  %v1979_v49 = vld [vmem:[#allocation10 + $0x18] sm:$0xff] }
 0x5dd   : > { %v1687_v54 = vpop.f32.mrb[32].mxu1  ;;  %2360 = vmatprep.subr.bf16.mxu1 %v3115_v52  ;;  %v2037_v52 = vld [vmem:[#allocation10 + $0x1e8] sm:$0xff] }
 0x5de   : > { %v1696_v56 = vmul.f32 %v3608_v53, %v1687_v54  ;;  %v3362_v61 = vpop.f32.mrb[33].mxu1  ;;  %v1981_v53 = vld [vmem:[#allocation10 + $0x28] sm:$0xff]  ;;  %v1984_v54 = vld [vmem:[#allocation10 + $0x40] sm:$0xff]  ;;  %2361 = vmatpush1.bf16.msra.mxu1 %v3114_v51 }
 0x5df   : > { %v1690_v62 = vpop.f32.mrb[34].mxu1  ;;  %v3117_v61 = vcombine.high %v1977_v50, %v1981_v53  ;;  %v2033_v51 = vld [vmem:[#allocation10 + $0x1c8] sm:$0xff] }
 0x5e0   : > { %v1713_v63 = vcombine.low %v1694_v55, %v1696_v56  ;;  %v1714_v0 = vcombine.high %v1694_v55, %v1696_v56  ;;  %v3363_v1 = vpop.f32.mrb[35].mxu1  ;;  %v1988_v55 = vld [vmem:[#allocation10 + $0x60] sm:$0xff]  ;;  %v3116_v56 = vcombine.low %v1977_v50, %v1981_v53  ;;  %v1983_v50 = vld [vmem:[#allocation10 + $0x38] sm:$0xff] }
 0x5e1   : > { %v3123_v62 = vcombine.high %v1984_v54, %v1988_v55  ;;  %v1992_v1 = vld [vmem:[#allocation10 + $0x80] sm:$0xff]  ;;  %2401 = vmatprep.subr.bf16.mxu0 %v3117_v61  ;;  %v3120_v53 = vcombine.low %v1979_v49, %v1983_v50  ;;  %v3173_v61 = vcombine.high %v2033_v51, %v2037_v52 }
 0x5e2   : > { %v1721_v57 = vrot.slane %v1713_v63, %v4253_v21  ;;  %v1728_v59 = vrot.slane %v1714_v0, %v4253_v21  ;;  %v1985_v63 = vld [vmem:[#allocation10 + $0x48] sm:$0xff] }
 0x5e3   : > { %v1989_v0 = vld [vmem:[#allocation10 + $0x68] sm:$0xff]  ;;  %2362 = vmatprep.subr.bf16.mxu1 %v3123_v62 }
 0x5e4   : > { %v1729_v58 = vcombine.low %v1705_v2, %v1721_v57  ;;  %v1730_v60 = vcombine.high %v1705_v2, %v1721_v57  ;;  %v1745_v4 = vcombine.low %v1712_v3, %v1728_v59  ;;  %v1746_v5 = vcombine.high %v1712_v3, %v1728_v59  ;;  %v1996_v3 = vld [vmem:[#allocation10 + $0xa0] sm:$0xff]  ;;  %v1993_v57 = vld [vmem:[#allocation10 + $0x88] sm:$0xff] }
 0x5e5   : > { %v3125_v2 = vcombine.high %v1985_v63, %v1989_v0  ;;  %v1997_v59 = vld [vmem:[#allocation10 + $0xa8] sm:$0xff] }
 0x5e6   : > { %v1737_v7 = vrot.slane %v1729_v58, %v4255_v28  ;;  %v1744_v8 = vrot.slane %v1730_v60, %v4255_v28  ;;  %v1753_v9 = vrot.slane %v1745_v4, %v4255_v28  ;;  %v1760_v10 = vrot.slane %v1746_v5, %v4255_v28 }
 0x5e7   : > { %v3122_v58 = vcombine.low %v1984_v54, %v1988_v55  ;;  %v3124_v60 = vcombine.low %v1985_v63, %v1989_v0  ;;  %v3131_v4 = vcombine.high %v1992_v1, %v1996_v3  ;;  %v3133_v5 = vcombine.high %v1993_v57, %v1997_v59 }
 0x5e8   : > { %v1765_v11 = vcombine.low %v1737_v7, %v1744_v8  ;;  %v3103_v12 = vcombine.high %v1737_v7, %v1744_v8  ;;  %v1781_v13 = vcombine.low %v1753_v9, %v1760_v10  ;;  %v3104_v14 = vcombine.high %v1753_v9, %v1760_v10  ;;  %v2004_v7 = vld [vmem:[#allocation10 + $0xe0] sm:$0xff]  ;;  %v2001_v8 = vld [vmem:[#allocation10 + $0xc8] sm:$0xff] }
 0x5e9   : > { %v2005_v9 = vld [vmem:[#allocation10 + $0xe8] sm:$0xff]  ;;  %2363 = vmatpush1.bf16.msra.mxu1 %v3122_v58  ;;  %v3130_v10 = vcombine.low %v1992_v1, %v1996_v3  ;;  %v3172_v63 = vcombine.low %v2033_v51, %v2037_v52  ;;  %v3121_v1 = vcombine.high %v1979_v49, %v1983_v50 }
 0x5ea   : > { %v1772_v15 = vrot.slane %v1765_v11, %v4253_v21  ;;  %v1780_v16 = vrot.slane %v3103_v12, %v4253_v21  ;;  %v1788_v17 = vrot.slane %v1781_v13, %v4253_v21  ;;  %v1796_v18 = vrot.slane %v3104_v14, %v4253_v21  ;;  %2364 = vmatprep.subr.bf16.mxu1 %v3131_v4 }
 0x5eb   : > { %v3132_v11 = vcombine.low %v1993_v57, %v1997_v59  ;;  %v3139_v12 = vcombine.high %v2000_v6, %v2004_v7  ;;  %v3141_v13 = vcombine.high %v2001_v8, %v2005_v9  ;;  %v3138_v14 = vcombine.low %v2000_v6, %v2004_v7  ;;  %v3628_v59 = vld [vmem:[%s4480_s1] ss:$0 sm:$0xff]  ;;  %v1987_v6 = vld [vmem:[#allocation10 + $0x58] sm:$0xff] }
 0x5ec   : > { %v1798_v20 = vcombine.high %v1772_v15, %v1780_v16  ;;  %v1814_v22 = vcombine.high %v1788_v17, %v1796_v18  ;;  %v1797_v23 = vcombine.low %v1772_v15, %v1780_v16  ;;  %v1813_v24 = vcombine.low %v1788_v17, %v1796_v18  ;;  %v1991_v7 = vld [vmem:[#allocation10 + $0x78] sm:$0xff] }
 0x5ed   : > { %2365 = vmatpush1.bf16.msra.mxu1 %v3130_v10  ;;  %v3140_v15 = vcombine.low %v2001_v8, %v2005_v9 }
 0x5ee   : > { %v1812_v25 = vrot.slane %v1798_v20, %v4255_v28  ;;  %v1828_v26 = vrot.slane %v1814_v22, %v4255_v28  ;;  %v1805_v38 = vrot.slane %v1797_v23, %v4255_v28  ;;  %v1821_v27 = vrot.slane %v1813_v24, %v4255_v28  ;;  %2366 = vmatprep.subr.bf16.mxu1 %v3139_v12  ;;  %v2008_v20 = vld [vmem:[#allocation10 + $0x100] sm:$0xff]  ;;  %v2009_v23 = vld [vmem:[#allocation10 + $0x108] sm:$0xff]  ;;  %v1994_v12 = vld [vmem:[#allocation10 + $0x90] sm:$0xff] }
 0x5ef   : > { %v2012_v22 = vld [vmem:[#allocation10 + $0x120] sm:$0xff] }
 0x5f0   : > { %v1831_v29 = vcombine.low %v1812_v25, %v1828_v26  ;;  %v1830_v30 = vcombine.high %v1805_v38, %v1821_v27  ;;  %v1832_v31 = vcombine.high %v1812_v25, %v1828_v26  ;;  %v1829_v32 = vcombine.low %v1805_v38, %v1821_v27  ;;  %v2013_v26 = vld [vmem:[#allocation10 + $0x128] sm:$0xff]  ;;  %v2016_v38 = vld [vmem:[#allocation10 + $0x140] sm:$0xff] }
 0x5f1   : > { %2367 = vmatpush1.bf16.msra.mxu1 %v3138_v14  ;;  %v3146_v24 = vcombine.low %v2008_v20, %v2012_v22  ;;  %v3147_v25 = vcombine.high %v2008_v20, %v2012_v22  ;;  %v2020_v27 = vld [vmem:[#allocation10 + $0x160] sm:$0xff]  ;;  %v1995_v14 = vld [vmem:[#allocation10 + $0x98] sm:$0xff]  ;;  %v2002_v20 = vld [vmem:[#allocation10 + $0xd0] sm:$0xff] }
 0x5f2   : > { %1838 = vrot.lane.b32.xlu0 %v1831_v29, %s3896_s21  ;;  %1834 = vrot.lane.b32.xlu1 %v1830_v30, %s3894_s19  ;;  %v3148_v29 = vcombine.low %v2009_v23, %v2013_v26  ;;  %v3149_v30 = vcombine.high %v2009_v23, %v2013_v26  ;;  %v2006_v22 = vld [vmem:[#allocation10 + $0xf0] sm:$0xff]  ;;  %v2003_v23 = vld [vmem:[#allocation10 + $0xd8] sm:$0xff] }
 0x5f3   : > { %2368 = vmatprep.subr.bf16.mxu1 %v3147_v25 }
 0x5f5   : > { %2369 = vmatpush1.bf16.msra.mxu1 %v3146_v24  ;;  %v2007_v24 = vld [vmem:[#allocation10 + $0xf8] sm:$0xff] }
 0x5f6   : > { %1842 = vrot.lane.b32.xlu1 %v1832_v31, %s3895_s22  ;;  %v3155_v31 = vcombine.high %v2016_v38, %v2020_v27  ;;  %s4513_s22 = sld [smem:[#allocation19_spill]] }
 0x5f8   : > { %2370 = vmatprep.subr.bf16.mxu1 %v3155_v31  ;;  %v2011_v31 = vld [vmem:[#allocation10 + $0x118] sm:$0xff] }
 0x5fc   : > { %s4435_s21 = scalar_lea.hbm %s4513_s22, %s3215_s16 }
 0x664   : > { %v1835_v21 = vpop.permute.xlu1 %1834  ;;  %v1839_v33 = vpop.permute.xlu0 %1838 }
 0x665   : > { %v1845_v34 = vsel %vm1278_vm1, %v1829_v32, %v1835_v21  ;;  %v2017_v32 = vld [vmem:[#allocation10 + $0x148] sm:$0xff] }
 0x666   : > { %v1847_v37 = vsel %vm1846_vm4, %v1845_v34, %v1839_v33  ;;  %v2021_v21 = vld [vmem:[#allocation10 + $0x168] sm:$0xff]  ;;  %v2024_v33 = vld [vmem:[#allocation10 + $0x180] sm:$0xff] }
 0x667   : > { %v3157_v34 = vcombine.high %v2017_v32, %v2021_v21 }
 0x668   : > { %v1843_v36 = vpop.permute.xlu1 %1842 }
 0x669   : > { %v1849_v28 = vsel %vm1848_vm5, %v1847_v37, %v1843_v36  ;;  %v2028_v36 = vld [vmem:[#allocation10 + $0x1a0] sm:$0xff]  ;;  %v2025_v37 = vld [vmem:[#allocation10 + $0x188] sm:$0xff] }
 0x66a   : > { %v1850_v39 = vpack.c.bf16 %v1849_v28, %v1849_v28  ;;  %v2029_v28 = vld [vmem:[#allocation10 + $0x1a8] sm:$0xff]  ;;  %v3162_v54 = vcombine.low %v2024_v33, %v2028_v36 }
 0x66b   : > { %v3164_v55 = vcombine.low %v2025_v37, %v2029_v28 }
 0x66c   : > { %3381 = vmatmul.mubr.bf16.vlgmr.msra.gmra.mrb[8].mxu0 %v1850_v39  ;;  %v3154_v39 = vcombine.low %v2016_v38, %v2020_v27  ;;  %v3143_v38 = vcombine.high %v2002_v20, %v2006_v22  ;;  %v3145_v27 = vcombine.high %v2003_v23, %v2007_v24 }
 0x66d   : > { %2433 = vmatprep.mubr.bf16.mxu0 %v3891_v35  ;;  %2402 = vmatpush1.bf16.msra.mxu0 %v3116_v56 }
 0x66e   : > { %2403 = vmatprep.subr.bf16.mxu0 %v3125_v2  ;;  %2371 = vmatpush1.bf16.msra.mxu1 %v3154_v39  ;;  %v2023_v39 = vld [vmem:[#allocation10 + $0x178] sm:$0xff] }
 0x671   : > { %2404 = vmatpush1.bf16.msra.mxu0 %v3124_v60  ;;  %v1986_v60 = vld [vmem:[#allocation10 + $0x50] sm:$0xff] }
 0x672   : > { %2405 = vmatprep.subr.bf16.mxu0 %v3133_v5  ;;  %v1990_v5 = vld [vmem:[#allocation10 + $0x70] sm:$0xff] }
 0x673   : > { %v3127_v10 = vcombine.high %v1986_v60, %v1990_v5 }
 0x675   : > { %2406 = vmatpush1.bf16.msra.mxu0 %v3132_v11  ;;  %v3129_v11 = vcombine.high %v1987_v6, %v1991_v7 }
 0x676   : > { %2407 = vmatprep.subr.bf16.mxu0 %v3141_v13  ;;  %v1998_v13 = vld [vmem:[#allocation10 + $0xb0] sm:$0xff] }
 0x677   : > { %v3134_v25 = vcombine.low %v1994_v12, %v1998_v13 }
 0x679   : > { %2408 = vmatpush1.bf16.msra.mxu0 %v3140_v15  ;;  %v1999_v15 = vld [vmem:[#allocation10 + $0xb8] sm:$0xff] }
 0x67a   : > { %2409 = vmatprep.subr.bf16.mxu0 %v3149_v30  ;;  %v3136_v26 = vcombine.low %v1995_v14, %v1999_v15  ;;  %v2014_v30 = vld [vmem:[#allocation10 + $0x130] sm:$0xff] }
 0x67d   : > { %2410 = vmatpush1.bf16.msra.mxu0 %v3148_v29  ;;  %v2010_v29 = vld [vmem:[#allocation10 + $0x110] sm:$0xff] }
 0x67e   : > { %2411 = vmatprep.subr.bf16.mxu0 %v3157_v34  ;;  %v3151_v34 = vcombine.high %v2010_v29, %v2014_v30 }
 0x73f   : > { %v1956_v41 = vpop.f32.mrb[8].mxu0 }
 0x740   : > { %v1957_v42 = vadd.f32 %v3105_v40, %v1956_v41  ;;  %v3382_v43 = vpop.f32.mrb[9].mxu0  ;;  %v3156_v40 = vcombine.low %v2017_v32, %v2021_v21  ;;  %v3163_v41 = vcombine.high %v2024_v33, %v2028_v36  ;;  %v2015_v32 = vld [vmem:[#allocation10 + $0x138] sm:$0xff]  ;;  %v3142_v21 = vcombine.low %v2002_v20, %v2006_v22  ;;  %v2018_v36 = vld [vmem:[#allocation10 + $0x150] sm:$0xff]  ;;  %v3580_v20 = vld [vmem:[#allocation11 + $0xe8] sm:$0xff]  }
 0x741   : > { %v1959_v44 = vpop.f32.mrb[10].mxu0  ;;  %v1978_v43 = vld [vmem:[#allocation10 + $0x10] sm:$0xff]  ;;  %v3144_v33 = vcombine.low %v2003_v23, %v2007_v24  ;;  %v3581_v22 = vld [vmem:[#allocation11 + $0x28] sm:$0xff]  }
 0x742   : > { %v4412_v46 = vadd.f32 %v3627_v45, %v1957_v42  ;;  %v3383_v47 = vpop.f32.mrb[11].mxu0  ;;  %v2032_v42 = vld [vmem:[#allocation10 + $0x1c0] sm:$0xff]  ;;  %v1982_v44 = vld [vmem:[#allocation10 + $0x30] sm:$0xff]  ;;  %v3165_v45 = vcombine.high %v2025_v37, %v2029_v28  ;;  %2412 = vmatpush1.bf16.msra.mxu0 %v3156_v40  ;;  %2372 = vmatprep.subr.bf16.mxu1 %v3163_v41  ;;  %v2019_v28 = vld [vmem:[#allocation10 + $0x158] sm:$0xff]  ;;  %v3150_v40 = vcombine.low %v2010_v29, %v2014_v30 }
 0x743   : > { %v2036_v47 = vld [vmem:[#allocation10 + $0x1e0] sm:$0xff]  ;;  %v3118_v48 = vcombine.low %v1978_v43, %v1982_v44  ;;  %2373 = vmatpush1.bf16.msra.mxu1 %v3162_v54  ;;  %v3119_v0 = vcombine.high %v1978_v43, %v1982_v44  ;;  %v2022_v37 = vld [vmem:[#allocation10 + $0x170] sm:$0xff]  ;;  %v3152_v41 = vcombine.low %v2011_v31, %v2015_v32  ;;  %v3161_v43 = vcombine.high %v2019_v28, %v2023_v39  ;;  %v3582_v23 = vld [vmem:[#allocation11 + $0xa8] sm:$0xff]  }
 0x744   : > { %1963 = vadd.xlane.f32.xlu1 %v4412_v46  ;;  %v3171_v56 = vcombine.high %v2032_v42, %v2036_v47  ;;  %2413 = vmatprep.subr.bf16.mxu0 %v3165_v45  ;;  %v3170_v62 = vcombine.low %v2032_v42, %v2036_v47  ;;  %v1971_v58 = vmul.f32 %v3628_v59, %v4412_v46  ;;  %v2026_v44 = vld [vmem:[#allocation10 + $0x190] sm:$0xff]  ;;  %v2027_v47 = vld [vmem:[#allocation10 + $0x198] sm:$0xff]  ;;  %v3561_v59 = vld [vmem:[#allocation11] sm:$0xff]  }
 0x745   : > { %v3159_v42 = vcombine.high %v2018_v36, %v2022_v37  ;;  %v2030_v45 = vld [vmem:[#allocation10 + $0x1b0] sm:$0xff]  ;;  %v3158_v49 = vcombine.low %v2018_v36, %v2022_v37  ;;  %v3160_v50 = vcombine.low %v2019_v28, %v2023_v39  ;;  %v3588_v29 = vld [vmem:[#allocation11 + $0xf8] sm:$0xff]  }
 0x746   : > { %2414 = vmatpush1.bf16.msra.mxu0 %v3164_v55  ;;  %2374 = vmatprep.subr.bf16.mxu1 %v3171_v56  ;;  %v3167_v51 = vcombine.high %v2026_v44, %v2030_v45  ;;  %v2038_v54 = vld [vmem:[#allocation10 + $0x1f0] sm:$0xff]  ;;  %v2035_v55 = vld [vmem:[#allocation10 + $0x1d8] sm:$0xff] }
 0x747   : > { %2415 = vmatprep.subr.bf16.mxu0 %v3173_v61  ;;  %2375 = vmatpush1.bf16.msra.mxu1 %v3170_v62  ;;  %v2039_v56 = vld [vmem:[#allocation10 + $0x1f8] sm:$0xff]  ;;  %v3166_v61 = vcombine.low %v2026_v44, %v2030_v45  ;;  %v3583_v24 = vld [vmem:[#allocation11 + $0x70] sm:$0xff]  }
 0x748   : > { %2442 = vmatprep.subr.bf16.mxu1 %v3119_v0  ;;  %v3177_v0 = vcombine.high %v2035_v55, %v2039_v56  ;;  %v3589_v30 = vld [vmem:[#allocation11 + $0x38] sm:$0xff]  }
 0x74a   : > { %2416 = vmatpush1.bf16.msra.mxu0 %v3172_v63 }
 0x74b   : > { %2483 = vmatprep.subr.bf16.mxu0 %v3121_v1 }
 0x7d1   : > { %v1964_v16 = vpop.xlane.xlu1 %1963 }
 0x7d2   : > { %v1965_v17 = vmul.f32 0.0078125, %v1964_v16  ;;  %v3126_v16 = vcombine.low %v1986_v60, %v1990_v5  ;;  %v3563_v60 = vld [vmem:[#allocation11 + $0x48] sm:$0xff]  }
 0x7d3   : > { %v3565_v5 = vld [vmem:[#allocation11 + $0x8] sm:$0xff]  }
 0x7d4   : > { %v1966_v18 = vsub.f32 %v4412_v46, %v1965_v17  ;;  %v3128_v17 = vcombine.low %v1987_v6, %v1991_v7  ;;  %v3566_v6 = vld [vmem:[#allocation11 + $0x88] sm:$0xff]   ;;  %v3567_v7 = vld [vmem:[#allocation11 + $0x50] sm:$0xff]  }
 0x7d6   : > { %v1967_v19 = vmul.f32 %v1966_v18, %v1966_v18  ;;  %v3135_v18 = vcombine.high %v1994_v12, %v1998_v13  ;;  %v3572_v12 = vld [vmem:[#allocation11 + $0xd8] sm:$0xff]  }
 0x7d7   : > { %v3573_v13 = vld [vmem:[#allocation11 + $0x18] sm:$0xff]  }
 0x7d8   : > { %1968 = vadd.xlane.f32.xlu0 %v1967_v19  ;;  %v3137_v19 = vcombine.high %v1995_v14, %v1999_v15  ;;  %v3574_v14 = vld [vmem:[#allocation11 + $0x98] sm:$0xff]   ;;  %v3575_v15 = vld [vmem:[#allocation11 + $0x60] sm:$0xff]  }
 0x865   : > { %v1969_v2 = vpop.xlane.xlu0 %1968 }
 0x866   : > { %v1970_v3 = vmul.f32 0.0078125, %v1969_v2  ;;  %v3176_v2 = vcombine.low %v2035_v55, %v2039_v56 }
 0x868   : > { %v1972_v57 = vadd.f32 1e-08, %v1970_v3  ;;  %v3559_v3 = vld [vmem:[#allocation11 + $0x40] sm:$0xff]  }
 0x86a   : > { %3609 = vrsqrt.f32 %v1972_v57  ;;  %v3560_v57 = vld [vmem:[#allocation11 + $0xc0] sm:$0xff]  }
 0x874   : > { %v3610_v4 = vpop.eup %3609 }
 0x875   : > { %v1974_v8 = vmul.f32 %v3610_v4, %v1971_v58  ;;  %v3562_v58 = vld [vmem:[#allocation11 + $0x80] sm:$0xff]   ;;  %v3564_v4 = vld [vmem:[#allocation11 + $0xc8] sm:$0xff]  }
 0x877   : > { %v4420_v9 = vpack.c.bf16 %v1974_v8, %v1974_v8  ;;  %v3568_v8 = vld [vmem:[#allocation11 + $0xd0] sm:$0xff]  }
 0x879   : > { %2393 = vmatmul.mubr.bf16.vlgmr.msra.gmra.mrb[36].mxu1 %v4420_v9  ;;  %2434 = vmatmul.mubr.bf16.vlgmr.msra.gmra.mrb[12].mxu0 %v4420_v9 }
 0x87a   : > { %2443 = vmatpush1.bf16.msra.mxu1 %v3118_v48  ;;  %2484 = vmatpush1.bf16.msra.mxu0 %v3120_v53  ;;  %v2031_v48 = vld [vmem:[#allocation10 + $0x1b8] sm:$0xff]  ;;  %v2034_v53 = vld [vmem:[#allocation10 + $0x1d0] sm:$0xff] }
 0x87b   : > { %2444 = vmatprep.subr.bf16.mxu1 %v3127_v10  ;;  %2485 = vmatprep.subr.bf16.mxu0 %v3129_v11  ;;  %v3169_v52 = vcombine.high %v2027_v47, %v2031_v48  ;;  %v3168_v62 = vcombine.low %v2027_v47, %v2031_v48  ;;  %v3175_v63 = vcombine.high %v2034_v53, %v2038_v54  ;;  %v3569_v10 = vld [vmem:[#allocation11 + $0x10] sm:$0xff]   ;;  %v3571_v11 = vld [vmem:[#allocation11 + $0x58] sm:$0xff]  }
 0x87c   : > { %2474 = vmatprep.mubr.bf16.mxu1 %v3891_v35  ;;  %2515 = vmatprep.mubr.bf16.mxu0 %v3891_v35  ;;  %v3153_v35 = vcombine.high %v2011_v31, %v2015_v32  ;;  %v3174_v1 = vcombine.low %v2034_v53, %v2038_v54  ;;  %v3590_v31 = vld [vmem:[#allocation11 + $0xb8] sm:$0xff]  }
 0x87e   : > { %2445 = vmatpush1.bf16.msra.mxu1 %v3126_v16  ;;  %2486 = vmatpush1.bf16.msra.mxu0 %v3128_v17  ;;  %v3576_v16 = vld [vmem:[#allocation11 + $0xe0] sm:$0xff]  }
 0x87f   : > { %2446 = vmatprep.subr.bf16.mxu1 %v3135_v18  ;;  %2487 = vmatprep.subr.bf16.mxu0 %v3137_v19  ;;  %v3577_v17 = vld [vmem:[#allocation11 + $0x20] sm:$0xff]   ;;  %v3579_v19 = vld [vmem:[#allocation11 + $0x68] sm:$0xff]  }
 0x880   : > { %v3578_v18 = vld [vmem:[#allocation11 + $0xa0] sm:$0xff]  }
 0x882   : > { %2447 = vmatpush1.bf16.msra.mxu1 %v3134_v25  ;;  %2488 = vmatpush1.bf16.msra.mxu0 %v3136_v26  ;;  %v3584_v25 = vld [vmem:[#allocation11 + $0xf0] sm:$0xff]  }
 0x883   : > { %2448 = vmatprep.subr.bf16.mxu1 %v3143_v38  ;;  %2489 = vmatprep.subr.bf16.mxu0 %v3145_v27  ;;  %v3585_v26 = vld [vmem:[#allocation11 + $0x30] sm:$0xff]   ;;  %v3587_v27 = vld [vmem:[#allocation11 + $0x78] sm:$0xff]  }
 0x884   : > { %v3586_v38 = vld [vmem:[#allocation11 + $0xb0] sm:$0xff]  }
 0x886   : > { %2449 = vmatpush1.bf16.msra.mxu1 %v3142_v21  ;;  %2490 = vmatpush1.bf16.msra.mxu0 %v3144_v33 }
 0x887   : > { %2450 = vmatprep.subr.bf16.mxu1 %v3151_v34  ;;  %2491 = vmatprep.subr.bf16.mxu0 %v3153_v35 }
 0x88a   : > { %2451 = vmatpush1.bf16.msra.mxu1 %v3150_v40  ;;  %2492 = vmatpush1.bf16.msra.mxu0 %v3152_v41 }
 0x88b   : > { %2452 = vmatprep.subr.bf16.mxu1 %v3159_v42  ;;  %2493 = vmatprep.subr.bf16.mxu0 %v3161_v43 }
 0x88e   : > { %2453 = vmatpush1.bf16.msra.mxu1 %v3158_v49  ;;  %2494 = vmatpush1.bf16.msra.mxu0 %v3160_v50 }
 0x88f   : > { %2454 = vmatprep.subr.bf16.mxu1 %v3167_v51  ;;  %2495 = vmatprep.subr.bf16.mxu0 %v3169_v52 }
 0x892   : > { %2455 = vmatpush1.bf16.msra.mxu1 %v3166_v61  ;;  %2496 = vmatpush1.bf16.msra.mxu0 %v3168_v62 }
 0x893   : > { %2456 = vmatprep.subr.bf16.mxu1 %v3175_v63  ;;  %2497 = vmatprep.subr.bf16.mxu0 %v3177_v0 }
 0x896   : > { %2457 = vmatpush1.bf16.msra.mxu1 %v3174_v1  ;;  %2498 = vmatpush1.bf16.msra.mxu0 %v3176_v2 }
 0x897   : > { %3252 = vmatprep.subr.bf16.mxu1 %v3559_v3  ;;  %3274 = vmatprep.subr.bf16.mxu0 %v3560_v57 }
 0x899   : > { %2475 = vmatmul.mubr.bf16.vlgmr.msra.gmra.mrb[40].mxu1 %v4420_v9  ;;  %2516 = vmatmul.mubr.bf16.vlgmr.msra.gmra.mrb[16].mxu0 %v4420_v9  ;;  %v3570_v9 = vld [vmem:[#allocation11 + $0x90] sm:$0xff]  }
 0x89a   : > { %3253 = vmatpush3.bf16.msra.mxu1 %v3561_v59  ;;  %3275 = vmatpush3.bf16.msra.mxu0 %v3562_v58 }
 0x89b   : > { %3254 = vmatprep.subr.bf16.mxu1 %v3563_v60  ;;  %3276 = vmatprep.subr.bf16.mxu0 %v3564_v4 }
 0x89e   : > { %3255 = vmatpush3.bf16.msra.mxu1 %v3565_v5  ;;  %3277 = vmatpush3.bf16.msra.mxu0 %v3566_v6 }
 0x89f   : > { %3256 = vmatprep.subr.bf16.mxu1 %v3567_v7  ;;  %3278 = vmatprep.subr.bf16.mxu0 %v3568_v8 }
 0x8a2   : > { %3257 = vmatpush3.bf16.msra.mxu1 %v3569_v10  ;;  %3279 = vmatpush3.bf16.msra.mxu0 %v3570_v9 }
 0x8a3   : > { %3258 = vmatprep.subr.bf16.mxu1 %v3571_v11  ;;  %3280 = vmatprep.subr.bf16.mxu0 %v3572_v12 }
 0x8a6   : > { %3259 = vmatpush3.bf16.msra.mxu1 %v3573_v13  ;;  %3281 = vmatpush3.bf16.msra.mxu0 %v3574_v14 }
 0x8a7   : > { %3260 = vmatprep.subr.bf16.mxu1 %v3575_v15  ;;  %3282 = vmatprep.subr.bf16.mxu0 %v3576_v16 }
 0x8aa   : > { %3261 = vmatpush3.bf16.msra.mxu1 %v3577_v17  ;;  %3283 = vmatpush3.bf16.msra.mxu0 %v3578_v18 }
 0x8ab   : > { %3262 = vmatprep.subr.bf16.mxu1 %v3579_v19  ;;  %3284 = vmatprep.subr.bf16.mxu0 %v3580_v20 }
 0x8ae   : > { %3263 = vmatpush3.bf16.msra.mxu1 %v3581_v22  ;;  %3285 = vmatpush3.bf16.msra.mxu0 %v3582_v23 }
 0x8af   : > { %3264 = vmatprep.subr.bf16.mxu1 %v3583_v24  ;;  %3286 = vmatprep.subr.bf16.mxu0 %v3584_v25 }
 0x8b2   : > { %3265 = vmatpush3.bf16.msra.mxu1 %v3585_v26  ;;  %3287 = vmatpush3.bf16.msra.mxu0 %v3586_v38 }
 0x8b3   : > { %3266 = vmatprep.subr.bf16.mxu1 %v3587_v27  ;;  %3288 = vmatprep.subr.bf16.mxu0 %v3588_v29 }
 0x8b6   : > { %3267 = vmatpush3.bf16.msra.mxu1 %v3589_v30  ;;  %3289 = vmatpush3.bf16.msra.mxu0 %v3590_v31 }
 0x94c   : > { %v2394_v32 = vpop.f32.mrb[36].mxu1  ;;  %v2435_v21 = vpop.f32.mrb[12].mxu0 }
 0x94d   : > { %v3178_v33 = vmul.f32 -1.442695, %v2394_v32  ;;  %v3180_v34 = vmul.f32 -1.442695, %v2435_v21  ;;  %v2396_v35 = vpop.f32.mrb[37].mxu1  ;;  %v2437_v36 = vpop.f32.mrb[13].mxu0 }
 0x94e   : > { %v3179_v37 = vmul.f32 -1.442695, %v2396_v35  ;;  %v3181_v28 = vmul.f32 -1.442695, %v2437_v36  ;;  %v2398_v39 = vpop.f32.mrb[38].mxu1  ;;  %v2439_v40 = vpop.f32.mrb[14].mxu0 }
 0x94f   : > { %3611 = vpow2.f32 %v3178_v33  ;;  %v2399_v41 = vpop.f32.mrb[39].mxu1  ;;  %v2440_v42 = vpop.f32.mrb[15].mxu0 }
 0x950   : > { %3613 = vpow2.f32 %v3180_v34 }
 0x951   : > { %3615 = vpow2.f32 %v3179_v37 }
 0x952   : > { %3617 = vpow2.f32 %v3181_v28 }
 0x959   : > { %v3612_v43 = vpop.eup %3611 }
 0x95a   : > { %v3614_v44 = vpop.eup %3613  ;;  %v2536_v45 = vadd.f32 1.0, %v3612_v43 }
 0x95b   : > { %v3616_v47 = vpop.eup %3615  ;;  %v2538_v48 = vadd.f32 1.0, %v3614_v44 }
 0x95c   : > { %v3618_v49 = vpop.eup %3617  ;;  %3619 = vrcp.f32 %v2536_v45  ;;  %v2537_v50 = vadd.f32 1.0, %v3616_v47 }
 0x95d   : > { %3621 = vrcp.f32 %v2538_v48  ;;  %v2539_v51 = vadd.f32 1.0, %v3618_v49 }
 0x95e   : > { %3623 = vrcp.f32 %v2537_v50 }
 0x95f   : > { %3625 = vrcp.f32 %v2539_v51 }
 0x966   : > { %v3620_v52 = vpop.eup %3619 }
 0x967   : > { %v3622_v53 = vpop.eup %3621  ;;  %v2548_v56 = vmul.f32 %v3620_v52, %v2394_v32 }
 0x968   : > { %v3624_v54 = vpop.eup %3623  ;;  %v2550_v61 = vmul.f32 %v3622_v53, %v2435_v21 }
 0x969   : > { %v3626_v55 = vpop.eup %3625  ;;  %v2549_v62 = vmul.f32 %v3624_v54, %v2396_v35 }
 0x96a   : > { %v2551_v63 = vmul.f32 %v3626_v55, %v2437_v36 }
 0x96c   : > { %v2476_v0 = vpop.f32.mrb[40].mxu1  ;;  %v2517_v1 = vpop.f32.mrb[16].mxu0 }
 0x96d   : > { %v2552_v2 = vmul.f32 %v2548_v56, %v2476_v0  ;;  %v2554_v3 = vmul.f32 %v2550_v61, %v2517_v1  ;;  %v2478_v57 = vpop.f32.mrb[41].mxu1  ;;  %v2519_v59 = vpop.f32.mrb[17].mxu0 }
 0x96e   : > { %v2553_v58 = vmul.f32 %v2549_v62, %v2478_v57  ;;  %v2555_v60 = vmul.f32 %v2551_v63, %v2519_v59  ;;  %v2480_v4 = vpop.f32.mrb[42].mxu1  ;;  %v2521_v5 = vpop.f32.mrb[18].mxu0 }
 0x96f   : > { %v2481_v6 = vpop.f32.mrb[43].mxu1  ;;  %v2522_v7 = vpop.f32.mrb[19].mxu0  ;;  %v2556_v9 = vpack.c.bf16 %v2552_v2, %v2552_v2  ;;  %v2558_v11 = vpack.c.bf16 %v2554_v3, %v2554_v3 }
 0x970   : > { %v2557_v8 = vpack.c.bf16 %v2553_v58, %v2553_v58  ;;  %v2559_v10 = vpack.c.bf16 %v2555_v60, %v2555_v60 }
 0x972   : > { %2848 = vmatprep.mubr.bf16.mxu1 %v2557_v8  ;;  %2888 = vmatprep.mubr.bf16.mxu0 %v2559_v10 }
 0x973   : > { %2849 = vmatmul.mubr.bf16.vlgmr.msra.gmra.mrb[44].mxu1 %v2556_v9  ;;  %2889 = vmatmul.mubr.bf16.vlgmr.msra.gmra.mrb[20].mxu0 %v2558_v11 }
 0xa46   : > { %v3268_v12 = vpop.f32.mrb[44].mxu1  ;;  %v3290_v13 = vpop.f32.mrb[20].mxu0 }
 0xa47   : > { %v3269_v14 = vpop.f32.mrb[45].mxu1  ;;  %v3291_v15 = vpop.f32.mrb[21].mxu0 }
 0xa48   : > { %v3270_v16 = vadd.f32 %v3269_v14, %v3268_v12  ;;  %v3292_v17 = vadd.f32 %v3291_v15, %v3290_v13  ;;  %v3271_v18 = vpop.f32.mrb[46].mxu1  ;;  %v3293_v19 = vpop.f32.mrb[22].mxu0 }
 0xa49   : > { %v3272_v20 = vpop.f32.mrb[47].mxu1  ;;  %v3294_v22 = vpop.f32.mrb[23].mxu0 }
 0xa4a   : > { %v2891_v23 = vadd.f32 %v3292_v17, %v3270_v16 }
 0xa4c   : > { %v2896_v24 = vadd.f32 %v2891_v23, %v4412_v46 }
 0xa4e   : > { %2897 = vst [vmem:[%s418_s28] sm:$0xff] %v2896_v24 }
 0xa4f   : > { %3812 = shalt.err (!%p3809_p1)
}
 0xa50   : > { %s3813_s24 = scalar_lea.hbm %s4435_s21, 128  ;;  %s3817_s28 = scalar_lea.hbm %s4513_s22, 256 }
 0xa51   : > { %p3814_p6 = scmp.ne.s32.totalorder %s4435_s21, %s3813_s24  ;;  %p3818_p8 = scmp.lt.u32.totalorder %s4435_s21, %s4513_s22 }
 0xa52   : > { %p3819_p0 = scmp.lt.u32.totalorder %s3817_s28, %s3813_s24  ;;  %p3821_p2 = scmp.lt.u32.totalorder %s3813_s24, %s4435_s21 }
 0xa53   : > { %p3815_p9 = pnand %p3814_p6, %p4514_p7 }
 0xa54   : > { %p3820_p5 = por %p3819_p0, %p3818_p8 }
 0xa55   : > { %p3816_p4 = pneg %p3815_p9 }
 0xa56   : > { %p3822_p10 = por %p3821_p2, %p3820_p5 }
 0xa58   : > { %p3823_p11 = pnand %p3822_p10, %p3816_p4 }
 0xa5a   : > { %3826 = shalt.err (!%p3823_p11)
}
 0xa5b   : > { %3406 = dma.vmem_to_hbm [thread:$0]  (%p4514_p7), %s4437_s20, 128, %s4435_s21, %s2899_s14  }
 0xa5c PF: > { %s2924_s18 = sand.u32 1, %s3865_s30   ;;  %p4515_p3 = scmp.ne.s32.totalorder %s4504_s13, 0 }
 0xa5d   : > { %p4516_p12 = scmp.ge.s32.totalorder %s3877_s12, 2  ;;  %s2925_s15 = scalar_lea.sflag [#allocation4], %s2924_s18 }
 0xa5f   : > { %p3429_p13 = pnand %p4516_p12, %p4515_p3 }
 0xa61   : > { %3860 = dma.done.wait (!%p3429_p13), %s2925_s15, 128  }
 0xa62   : > { %3862 = vsyncadd (!%p3429_p13), %s2925_s15, 4294967168  ;;  %p25_p1 = scmp.ge.s32.totalorder %s4110_s27, 4   ;;  %s4517_s30 = smov %s3869_s10 }
 0xa63   : > { %s4518_s10 = smov %s3873_s11  ;;  %s4519_s11 = smov %s4122_s25 }
 0xa64   : > { %s4520_s12 = smov %s4110_s27  ;;  %27 = sbr.rel (!%p25_p1) target bundleno = 10 (0xa), region = 121 }
 0xa6b   :  { %2930 = vsyncpa [#allocation3], 1 }
 0xa6c   :  { %2932 = vsyncpa [#allocation3 + $0x1], 1 }
 0xa6d   :  { %2933 = vsyncpa [#allocation6], 1 }
 0xa6e   :  { %2934 = vsyncpa [#allocation9], 1 }
 0xa6f   :  { %2935 = vsyncpa [#allocation12], 1 }
 0xa70   :  { %2936 = vsyncpa [#allocation4], 1 }
 0xa71   :  { %2938 = vsyncpa [#allocation4 + $0x1], 1 }

</bundles_post_ra>
